<compile_context>
chip_gen: v7x
topology: tpu7x:2x2x1
jax: 0.10.0
libtpu: 0.0.40
codegen_flags: <defaults>
</compile_context>

<pallas_src>
import numpy as np
import jax
import jax.numpy as jnp
from jax import lax
from jax.experimental import pallas as pl
from jax.experimental.pallas import tpu as pltpu


def _round_up(x, m):
    return (x + m - 1) // m * m


def _subtree_heights(left, right, is_leaf, root):
    """Height of every node in root's subtree (leaves = 0), iterative post-order."""
    heights = {}
    stack = [(int(root), False)]
    while stack:
        node, ready = stack.pop()
        if bool(is_leaf[node]):
            heights[node] = 0
        elif ready:
            heights[node] = 1 + max(heights[int(left[node])], heights[int(right[node])])
        else:
            stack.append((node, True))
            stack.append((int(right[node]), False))
            stack.append((int(left[node]), False))
    return heights


def _build_schedule(left, right, is_leaf, root, max_tile=256):
    """Level schedule + node renumbering.

    New numbering: leaves occupy rows [0, l_pad); internal nodes occupy
    contiguous rows in schedule order starting at l_pad, each level padded to a
    multiple of m_tile, so tile t writes rows [l_pad + t*m_tile, l_pad + (t+1)*m_tile).
    Padding rows gather leaf row 0 and write a dedicated row that is never read.
    """
    heights = _subtree_heights(left, right, is_leaf, root)
    leaves = sorted(n for n in heights if bool(is_leaf[n]))
    new_id = {n: i for i, n in enumerate(leaves)}
    l_pad = _round_up(max(len(leaves), 16), 16)            # bf16 sublane packing

    internal = [n for n in heights if not bool(is_leaf[n])]
    max_h = max(heights[n] for n in internal)
    levels = [[n for n in internal if heights[n] == d] for d in range(1, max_h + 1)]
    max_width = max(len(lv) for lv in levels)
    m_tile = min(max_tile, _round_up(max_width, 16))       # MXU-friendly tile height

    li, ri = [], []
    flat = 0
    root_flat = -1
    for lv in levels:
        n_rows = _round_up(len(lv), m_tile)
        for k in range(n_rows):
            if k < len(lv):
                n = lv[k]
                new_id[n] = l_pad + flat + k
                if n == root:
                    root_flat = flat + k
                # children have strictly smaller height -> ids already assigned
                li.append(new_id[int(left[n])])
                ri.append(new_id[int(right[n])])
            else:
                li.append(0)   # padding row: reads leaf row 0, output row never read
                ri.append(0)
        flat += n_rows
    assert root_flat >= 0
    num_tiles = flat // m_tile
    n_pad = l_pad + flat                                   # total table rows (mult of 16)

    li = np.asarray(li, np.int32).reshape(flat, 1)
    ri = np.asarray(ri, np.int32).reshape(flat, 1)
    leaf_ids = np.asarray(leaves, np.int64)
    return li, ri, leaf_ids, l_pad, m_tile, num_tiles, n_pad, root_flat


def _make_tree_kernel(m_tile, n_pad, l_pad, root_tile, root_row):
    def kernel(li_ref, ri_ref, leaf_ref, wt_ref, bias_ref, out_ref, emb_ref):
        t = pl.program_id(0)

        # Initialize the node-embedding table once: zeros (guards against stale
        # VMEM NaNs under the one-hot gather) + leaf rows.
        @pl.when(t == 0)
        def _init():
            emb_ref[...] = jnp.zeros_like(emb_ref)
            emb_ref[0:l_pad, :] = leaf_ref[...]

        # Vectorized gather on the MXU: bf16 one-hot selection matrices.
        iota = lax.broadcasted_iota(jnp.int32, (m_tile, n_pad), 1)
        sel_a = (iota == li_ref[...]).astype(jnp.bfloat16)
        sel_b = (iota == ri_ref[...]).astype(jnp.bfloat16)

        emb = emb_ref[...]
        a = jnp.dot(sel_a, emb, preferred_element_type=jnp.float32).astype(jnp.bfloat16)
        b = jnp.dot(sel_b, emb, preferred_element_type=jnp.float32).astype(jnp.bfloat16)
        ab = jnp.concatenate([a, b], axis=1)               # (m_tile, 1024) bf16

        # tanh(cat(a, b) @ W.T + bias): single encoder dot, f32 accumulate.
        acc = jnp.dot(ab, wt_ref[...], preferred_element_type=jnp.float32)
        act = jnp.tanh(acc + bias_ref[...])                # f32 tanh (v5e: no bf16 EUP)

        # Contiguous, 16-aligned scatter of this level tile into the table.
        base = pl.multiple_of(l_pad + t * m_tile, 16)
        emb_ref[pl.ds(base, m_tile), :] = act.astype(jnp.bfloat16)

        # Emit the root embedding (f32, straight from this tile's activations).
        @pl.when(t == root_tile)
        def _final():
            out_ref[...] = act[root_row:root_row + 1, :]

    return kernel


def rae_forward(left, right, is_leaf, inp, root, wt, bias):
    """Mirrors RAEScript.forward; wt = encoder.weight.T with shape (1024, 512)."""
    left = np.asarray(left)
    right = np.asarray(right)
    is_leaf = np.asarray(is_leaf)
    root = int(root)
    inp = np.asarray(inp, np.float32)

    if bool(is_leaf[root]):
        return jnp.asarray(inp[root])

    in_dim, h = wt.shape
    assert in_dim == 2 * h

    (li, ri, leaf_ids, l_pad, m_tile,
     num_tiles, n_pad, root_flat) = _build_schedule(left, right, is_leaf, root)
    root_tile, root_row = root_flat // m_tile, root_flat % m_tile

    # Only the leaf rows are shipped (bf16); internal rows of `inp` are unused.
    leaf_tab = np.zeros((l_pad, h), np.float32)
    leaf_tab[:len(leaf_ids)] = inp[leaf_ids]
    leaf_tab = jnp.asarray(leaf_tab, jnp.bfloat16)

    wt16 = jnp.asarray(wt, jnp.bfloat16)
    bias2 = jnp.asarray(bias, jnp.float32).reshape(1, h)

    const = lambda t: (0, 0)     # resident blocks: same block every grid step
    sched = lambda t: (t, 0)     # per-tile index vectors
    grid_spec = pltpu.PrefetchScalarGridSpec(
        num_scalar_prefetch=0,
        grid=(num_tiles,),
        in_specs=[
            pl.BlockSpec((m_tile, 1), sched),    # left-child rows (renumbered ids)
            pl.BlockSpec((m_tile, 1), sched),    # right-child rows
            pl.BlockSpec((l_pad, h), const),     # leaf embeddings (resident, bf16)
            pl.BlockSpec((in_dim, h), const),    # encoder.weight.T (resident, bf16)
            pl.BlockSpec((1, h), const),         # bias (f32)
        ],
        out_specs=pl.BlockSpec((1, h), const),
        scratch_shapes=[pltpu.VMEM((n_pad, h), jnp.bfloat16)],  # node-embedding table
    )

    cost = pl.CostEstimate(
        flops=num_tiles * (2 * 2 * m_tile * n_pad * h + 2 * m_tile * in_dim * h),
        transcendentals=num_tiles * m_tile * h,
        bytes_accessed=(l_pad * h * 2 + in_dim * h * 2 + h * 4 + h * 4
                        + 2 * li.size * 4 + num_tiles * n_pad * h * 2),
    )

    out = pl.pallas_call(
        _make_tree_kernel(m_tile, n_pad, l_pad, root_tile, root_row),
        out_shape=jax.ShapeDtypeStruct((1, h), jnp.float32),
        grid_spec=grid_spec,
        compiler_params=pltpu.CompilerParams(
            dimension_semantics=("arbitrary",)),  # levels carry the dependency
        cost_estimate=cost,
    )(jnp.asarray(li), jnp.asarray(ri), leaf_tab, wt16, bias2)
    return out.reshape(h)


def rae_forward_ref(left, right, is_leaf, inp, root, wt, bias):
    """Pure f32 numpy reference matching the PyTorch recursion."""
    inp = np.asarray(inp, np.float32)
    wt = np.asarray(wt, np.float32)
    bias = np.asarray(bias, np.float32)

    def rec(n):
        if bool(is_leaf[n]):
            return inp[n]
        a = rec(int(left[n]))
        b = rec(int(right[n]))
        return np.tanh(np.concatenate([a, b]) @ wt + bias)

    return rec(int(root))


if __name__ == "__main__":
    key = jax.random.PRNGKey(0)
    k_w, k_b, k_x = jax.random.split(key, 3)

    H = 512            # encoder output dim (nn.Linear(1024, 512))
    IN_DIM = 2 * H

    bound = 1.0 / np.sqrt(IN_DIM)
    wt = jax.random.uniform(k_w, (IN_DIM, H), jnp.float32, -bound, bound)   # W.T
    bias = jax.random.uniform(k_b, (H,), jnp.float32, -bound, bound)

    # Complete binary tree: leaves 0..7, internal nodes 8..14, root 14.
    left = np.array([-1] * 8 + [0, 2, 4, 6, 8, 10, 12], dtype=np.int32)
    right = np.array([-1] * 8 + [1, 3, 5, 7, 9, 11, 13], dtype=np.int32)
    is_leaf = np.array([True] * 8 + [False] * 7)
    root = 14

    # Node input embeddings [num_nodes, 512] (only leaf rows are actually used).
    inp = jax.random.normal(k_x, (len(left), H), jnp.float32)

    out = rae_forward(left, right, is_leaf, np.asarray(inp), root,
                      np.asarray(wt), np.asarray(bias))
    out = jax.block_until_ready(out)

    ref = rae_forward_ref(left, right, is_leaf, np.asarray(inp), root,
                          np.asarray(wt), np.asarray(bias))
    np.testing.assert_allclose(np.asarray(out), ref, rtol=2e-2, atol=2e-2)
    assert out.shape == (H,)
    print("KERNEL_OK")
</pallas_src>

<mosaic_0001>
module attributes {stable_mosaic.version = 11 : i64} {
  func.func @kernel(%arg0: i32, %arg1: memref<16x1xi32, #tpu.memory_space<vmem>>, %arg2: memref<16x1xi32, #tpu.memory_space<vmem>>, %arg3: memref<16x512xbf16, #tpu.memory_space<vmem>>, %arg4: memref<1024x512xbf16, #tpu.memory_space<vmem>>, %arg5: memref<1x512xf32, #tpu.memory_space<vmem>>, %arg6: memref<1x512xf32, #tpu.memory_space<vmem>>, %arg7: memref<64x512xbf16, #tpu.memory_space<vmem>>) attributes {dimension_semantics = [#tpu.dimension_semantics<arbitrary>], iteration_bounds = array<i64: 3>, scalar_prefetch = 0 : i64, scratch_operands = 1 : i64, tpu.core_type = #tpu.core_type<tc>, window_params = [{transform_indices = @transform_0, window_bounds = array<i64: 16, 1>}, {transform_indices = @transform_1, window_bounds = array<i64: 16, 1>}, {pipeline_mode = #tpu.pipeline_mode<synchronous>, transform_indices = @transform_2, window_bounds = array<i64: 16, 512>}, {pipeline_mode = #tpu.pipeline_mode<synchronous>, transform_indices = @transform_3, window_bounds = array<i64: 1024, 512>}, {pipeline_mode = #tpu.pipeline_mode<synchronous>, transform_indices = @transform_4, window_bounds = array<i64: 1, 512>}, {pipeline_mode = #tpu.pipeline_mode<synchronous>, transform_indices = @transform_5, window_bounds = array<i64: 1, 512>}]} {
    %c0_i32 = arith.constant 0 : i32
    %0 = arith.cmpi eq, %arg0, %c0_i32 : i32
    %1 = arith.extui %0 : i1 to i32
    %c0_i32_0 = arith.constant 0 : i32
    %2 = arith.cmpi ne, %1, %c0_i32_0 : i32
    scf.if %2 {
      %cst_15 = arith.constant 0.000000e+00 : bf16
      %37 = vector.broadcast %cst_15 : bf16 to vector<64x512xbf16>
      %c0_16 = arith.constant 0 : index
      %c0_17 = arith.constant 0 : index
      %38 = vector.load %arg7[%c0_16, %c0_17] : memref<64x512xbf16, #tpu.memory_space<vmem>>, vector<64x512xbf16>
      tpu.vector_store %arg7[%c0_16, %c0_17], %37 {strides = array<i32>} : memref<64x512xbf16, #tpu.memory_space<vmem>>, vector<64x512xbf16>,
      %c0_18 = arith.constant 0 : index
      %c0_19 = arith.constant 0 : index
      %39 = vector.load %arg3[%c0_18, %c0_19] : memref<16x512xbf16, #tpu.memory_space<vmem>>, vector<16x512xbf16>
      %c0_20 = arith.constant 0 : index
      %c0_21 = arith.constant 0 : index
      %40 = vector.load %arg7[%c0_20, %c0_21] : memref<64x512xbf16, #tpu.memory_space<vmem>>, vector<16x512xbf16>
      tpu.vector_store %arg7[%c0_20, %c0_21], %39 {strides = array<i32>} : memref<64x512xbf16, #tpu.memory_space<vmem>>, vector<16x512xbf16>,
    } else {
    }
    %3 = tpu.iota {dimensions = array<i32: 1>} : vector<16x64xi32>
    %c0 = arith.constant 0 : index
    %c0_1 = arith.constant 0 : index
    %4 = vector.load %arg1[%c0, %c0_1] : memref<16x1xi32, #tpu.memory_space<vmem>>, vector<16x1xi32>
    %5 = vector.broadcast %4 : vector<16x1xi32> to vector<16x64xi32>
    %6 = arith.cmpi eq, %3, %5 : vector<16x64xi32>
    %7 = arith.extui %6 : vector<16x64xi1> to vector<16x64xi32>
    %8 = arith.sitofp %7 : vector<16x64xi32> to vector<16x64xf32>
    %9 = arith.truncf %8 : vector<16x64xf32> to vector<16x64xbf16>
    %c0_2 = arith.constant 0 : index
    %c0_3 = arith.constant 0 : index
    %10 = vector.load %arg2[%c0_2, %c0_3] : memref<16x1xi32, #tpu.memory_space<vmem>>, vector<16x1xi32>
    %11 = vector.broadcast %10 : vector<16x1xi32> to vector<16x64xi32>
    %12 = arith.cmpi eq, %3, %11 : vector<16x64xi32>
    %13 = arith.extui %12 : vector<16x64xi1> to vector<16x64xi32>
    %14 = arith.sitofp %13 : vector<16x64xi32> to vector<16x64xf32>
    %15 = arith.truncf %14 : vector<16x64xf32> to vector<16x64xbf16>
    %c0_4 = arith.constant 0 : index
    %c0_5 = arith.constant 0 : index
    %16 = vector.load %arg7[%c0_4, %c0_5] : memref<64x512xbf16, #tpu.memory_space<vmem>>, vector<64x512xbf16>
    %cst = arith.constant dense<0.000000e+00> : vector<16x512xf32>
    %17 = tpu.matmul %9, %16, %cst {dimension_numbers = #tpu.dot_dimension_numbers<[1], [0], [0], [1], [0, 0, 1, 1], [], []>} : vector<16x64xbf16>, vector<64x512xbf16>, vector<16x512xf32> -> vector<16x512xf32>
    %18 = arith.truncf %17 : vector<16x512xf32> to vector<16x512xbf16>
    %cst_6 = arith.constant dense<0.000000e+00> : vector<16x512xf32>
    %19 = tpu.matmul %15, %16, %cst_6 {dimension_numbers = #tpu.dot_dimension_numbers<[1], [0], [0], [1], [0, 0, 1, 1], [], []>} : vector<16x64xbf16>, vector<64x512xbf16>, vector<16x512xf32> -> vector<16x512xf32>
    %20 = arith.truncf %19 : vector<16x512xf32> to vector<16x512xbf16>
    %21 = tpu.concatenate %18, %20 in 1 : vector<16x512xbf16>, vector<16x512xbf16> -> vector<16x1024xbf16>
    %c0_7 = arith.constant 0 : index
    %c0_8 = arith.constant 0 : index
    %22 = vector.load %arg4[%c0_7, %c0_8] : memref<1024x512xbf16, #tpu.memory_space<vmem>>, vector<1024x512xbf16>
    %cst_9 = arith.constant dense<0.000000e+00> : vector<16x512xf32>
    %23 = tpu.matmul %21, %22, %cst_9 {dimension_numbers = #tpu.dot_dimension_numbers<[1], [0], [0], [1], [0, 0, 1, 1], [], []>} : vector<16x1024xbf16>, vector<1024x512xbf16>, vector<16x512xf32> -> vector<16x512xf32>
    %c0_10 = arith.constant 0 : index
    %c0_11 = arith.constant 0 : index
    %24 = vector.load %arg5[%c0_10, %c0_11] : memref<1x512xf32, #tpu.memory_space<vmem>>, vector<1x512xf32>
    %25 = vector.broadcast %24 : vector<1x512xf32> to vector<16x512xf32>
    %26 = arith.addf %23, %25 : vector<16x512xf32>
    %27 = math.tanh %26 : vector<16x512xf32>
    %c16_i32 = arith.constant 16 : i32
    %28 = arith.muli %arg0, %c16_i32 : i32
    %c16_i32_12 = arith.constant 16 : i32
    %29 = arith.addi %c16_i32_12, %28 : i32
    %30 = tpu.assume_multiple %29, 16 : i32
    %31 = arith.truncf %27 : vector<16x512xf32> to vector<16x512xbf16>
    %32 = arith.index_cast %30 : i32 to index
    %c0_13 = arith.constant 0 : index
    %33 = vector.load %arg7[%32, %c0_13] : memref<64x512xbf16, #tpu.memory_space<vmem>>, vector<16x512xbf16>
    tpu.vector_store %arg7[%32, %c0_13], %31 {strides = array<i32>} : memref<64x512xbf16, #tpu.memory_space<vmem>>, vector<16x512xbf16>,
    %c2_i32 = arith.constant 2 : i32
    %34 = arith.cmpi eq, %arg0, %c2_i32 : i32
    %35 = arith.extui %34 : i1 to i32
    %c0_i32_14 = arith.constant 0 : i32
    %36 = arith.cmpi ne, %35, %c0_i32_14 : i32
    scf.if %36 {
      %37 = vector.extract_strided_slice %27 {offsets = [0, 0], sizes = [1, 512], strides = [1, 1]} : vector<16x512xf32> to vector<1x512xf32>
      %c0_15 = arith.constant 0 : index
      %c0_16 = arith.constant 0 : index
      %38 = vector.load %arg6[%c0_15, %c0_16] : memref<1x512xf32, #tpu.memory_space<vmem>>, vector<1x512xf32>
      tpu.vector_store %arg6[%c0_15, %c0_16], %37 {strides = array<i32>} : memref<1x512xf32, #tpu.memory_space<vmem>>, vector<1x512xf32>,
    } else {
    }
    return
  }
  func.func @transform_0(%arg0: i32) -> (i32, i32) {
    %c0_i32 = arith.constant 0 : i32
    %c0_i32_0 = arith.constant 0 : i32
    return %arg0, %c0_i32 : i32, i32
  }
  func.func @transform_1(%arg0: i32) -> (i32, i32) {
    %c0_i32 = arith.constant 0 : i32
    %c0_i32_0 = arith.constant 0 : i32
    return %arg0, %c0_i32 : i32, i32
  }
  func.func @transform_2(%arg0: i32) -> (i32, i32) {
    %c0_i32 = arith.constant 0 : i32
    %c0_i32_0 = arith.constant 0 : i32
    %c0_i32_1 = arith.constant 0 : i32
    return %c0_i32, %c0_i32_0 : i32, i32
  }
  func.func @transform_3(%arg0: i32) -> (i32, i32) {
    %c0_i32 = arith.constant 0 : i32
    %c0_i32_0 = arith.constant 0 : i32
    %c0_i32_1 = arith.constant 0 : i32
    return %c0_i32, %c0_i32_0 : i32, i32
  }
  func.func @transform_4(%arg0: i32) -> (i32, i32) {
    %c0_i32 = arith.constant 0 : i32
    %c0_i32_0 = arith.constant 0 : i32
    %c0_i32_1 = arith.constant 0 : i32
    return %c0_i32, %c0_i32_0 : i32, i32
  }
  func.func @transform_5(%arg0: i32) -> (i32, i32) {
    %c0_i32 = arith.constant 0 : i32
    %c0_i32_0 = arith.constant 0 : i32
    %c0_i32_1 = arith.constant 0 : i32
    return %c0_i32, %c0_i32_0 : i32, i32
  }
}

</mosaic_0001>

<bundles_post_ra>
// kernel: tpu_custom_call.1
= control target key start
LH: loop header
LB: loop body
LE: loop exit
PB: predicated region body
PF: predicated region fallthrough
CT: control target
= control target key end

     0   :  { %10 = vsyncpa [#allocation4], 0  ;;  %s3576_s0 = inlined_call_operand.vmem [shape: s32[48,1], index: 0, kind: input, shape index: {}]   ;;  %s3577_s1 = inlined_call_operand.vmem [shape: s32[48,1], index: 1, kind: input, shape index: {}]   ;;  %s3578_s2 = inlined_call_operand.vmem [shape: bf16[16,512], index: 2, kind: input, shape index: {}]   ;;  %s3579_s3 = inlined_call_operand.hbm [shape: bf16[1024,512], index: 3, kind: input, shape index: {}]   ;;  %s3580_s4 = inlined_call_operand.vmem [shape: f32[1,512], index: 4, kind: input, shape index: {}]   ;;  %s3581_s5 = inlined_call_operand.hbm [shape: f32[1,512], index: 5, kind: output, shape index: {}]  }
   0x1   :  { %11 = vsyncpa [#allocation5], 0  ;;  %s3437_s18 = smov 0  }
   0x2 LB: > { %s3443_s19 = sadd.s32 4294967295, %s3397_s18   ;;  %p2570_p0 = scmp.ge.s32.totalorder %s3397_s18, 1  ;;  %s3397_s18 = sphi %s3437_s18, %s17_s18  }
   0x3   : > { %p158_p1 = scmp.lt.s32.totalorder %s3397_s18, 4  ;;  %s3399_s20 = smov [#allocation3]  }
   0x4   : > { %s173_s21 = sshll.u32 %s3399_s20, 4  ;;  %p3582_p4 = scmp.eq.s32.totalorder %s3443_s19, 0  ;;  %s174_s21 = int_to_ptr.vmem [resolvable:$true] %s173_s21 }
   0x5   : > { %p3448_p3 = pnand %p2570_p0, %p158_p1  ;;  %s3329_s26 = scalar_lea.hbm %s3579_s3, 32768 }
   0x6   : > { %p3330_p7 = scmp.ne.s32.totalorder %s3579_s3, %s3329_s26  ;;  %p3336_p11 = scmp.lt.u32.totalorder %s3329_s26, %s3579_s3 }
   0x7   : > { %s3584_s22 = scalar_select %p3448_p3, 1, 0 }
   0x8   : > { %p2897_p5 = pneg %p3448_p3 }
   0xa   : > { %p3457_p6 = pnand %p3582_p4, %p2897_p5 }
   0xc   : > { %p3331_p8 = pneg %p3457_p6 }
   0xe   : > { %p3332_p9 = pnand %p3331_p8, %p3330_p7 }
  0x10   : > { %p3333_p10 = pneg %p3332_p9 }
  0x12   : > { %p3338_p12 = pnand %p3336_p11, %p3333_p10 }
  0x14   : > { %3341 = shalt.err (!%p3338_p12)
}
  0x15   : > { %s3342_s6 = scalar_lea.vmem %s174_s21, 32768  ;;  %p3350_p5 = scmp.lt.s32.totalorder %s174_s21, %s174_s21 }
  0x16   : > { %p3343_p13 = scmp.ne.s32.totalorder %s174_s21, %s3342_s6  ;;  %p3351_p2 = scmp.lt.s32.totalorder %s3342_s6, %s3342_s6 }
  0x18   : > { %p3345_p0 = pnand %p3343_p13, %p3331_p8  ;;  %p3352_p4 = por %p3351_p2, %p3350_p5 }
  0x1a   : > { %p3346_p1 = pneg %p3345_p0 }
  0x1c   : > { %p3353_p3 = pnand %p3352_p4, %p3346_p1 }
  0x1e   : > { %3356 = shalt.err (!%p3353_p3)
}
  0x1f   : > { %s3400_s7 = smov 256   ;;  %s3401_s8 = smov 16  }
  0x20   : > { %2900 = dma.hbm_to_vmem [thread:$0]  (!%p3457_p6), %s3579_s3, 32768, %s174_s21, [#allocation4], %s3400_s7, %s3400_s7, %s3401_s8  }
  0x21   : > { %p3586_p7 = scmp.ne.s32.totalorder %s3584_s22, 0 }
  0x22   : > { %p3587_p9 = scmp.eq.s32.totalorder (!%p3586_p7), %s3443_s19, 0 }
  0x23   : > { %210 = sbr.rel (%p3586_p7) target bundleno = 863 (0x35f), region = 40 }
  0x2a   : > { %3388 = dma.done.wait (%p3587_p9), [#allocation4], 32768   ;;  %p3588_p8 = pmov %p3587_p9 }
  0x2b   : > { %s2575_s11 = sshll.u32 %s3443_s19, 1  ;;  %p3589_p3 = scmp.ne.s32.totalorder %s3443_s19, 0 }
  0x2c   : > { %3390 = vsyncadd (%p3588_p8), [#allocation4], 4294934528  ;;  %p239_p2 = scmp.lt.s32.totalorder %s2575_s11, 5  ;;  %v2921_v0 = vld [vmem:[%s3578_s2] ss:$16 sps:$4 sm:$0xff] (!%p3589_p3)   ;;  %v3402_v1 = vmov (!%p3589_p3), 0  }
  0x2d   : > { %254 = sbr.rel (%p3589_p3) target bundleno = 53 (0x35), region = 48  ;;  %259 = vst [vmem:[#allocation2 + $0x20] sm:$0xff] (!%p3589_p3), %v3402_v1  ;;  %260 = vst [vmem:[#allocation2 + $0x28] sm:$0xff] (!%p3589_p3), %v3402_v1  ;;  %v2923_v2 = vld [vmem:[%s3578_s2 + $0x4] ss:$16 sps:$4 sm:$0xff] (!%p3589_p3)  }
  0x2e   : > { %s3591_s11 = smov (!%p239_p2, %s2575_s11), 5  ;;  %261 = vst [vmem:[#allocation2 + $0x30] sm:$0xff] (!%p3589_p3), %v3402_v1  ;;  %262 = vst [vmem:[#allocation2 + $0x38] sm:$0xff] (!%p3589_p3), %v3402_v1  ;;  %v2924_v3 = vld [vmem:[%s3578_s2 + $0x8] ss:$16 sps:$4 sm:$0xff] (!%p3589_p3)  }
  0x2f   : > { %s2576_s12 = sshll.u32 %s3591_s11, 3  ;;  %263 = vst [vmem:[#allocation2 + $0x40] sm:$0xff] (!%p3589_p3), %v3402_v1  ;;  %264 = vst [vmem:[#allocation2 + $0x48] sm:$0xff] (!%p3589_p3), %v3402_v1  ;;  %v2926_v4 = vld [vmem:[%s3578_s2 + $0xc] ss:$16 sps:$4 sm:$0xff] (!%p3589_p3)  }
  0x30   : > { %s3487_s15 = scalar_lea.vmem %s3576_s0, %s2576_s12  ;;  %s3492_s20 = scalar_lea.vmem %s3577_s1, %s2576_s12  ;;  %265 = vst [vmem:[#allocation2 + $0x50] sm:$0xff] (!%p3589_p3), %v3402_v1  ;;  %266 = vst [vmem:[#allocation2 + $0x58] sm:$0xff] (!%p3589_p3), %v3402_v1 }
  0x31   : > { %267 = vst [vmem:[#allocation2 + $0x60] sm:$0xff] (!%p3589_p3), %v3402_v1  ;;  %268 = vst [vmem:[#allocation2 + $0x68] sm:$0xff] (!%p3589_p3), %v3402_v1 }
  0x32   : > { %269 = vst [vmem:[#allocation2 + $0x70] sm:$0xff] (!%p3589_p3), %v3402_v1  ;;  %270 = vst [vmem:[#allocation2 + $0x78] sm:$0xff] (!%p3589_p3), %v3402_v1 }
  0x33   : > { %295 = vst [vmem:[#allocation2] sm:$0xff] (!%p3589_p3), %v2921_v0  ;;  %296 = vst [vmem:[#allocation2 + $0x8] sm:$0xff] (!%p3589_p3), %v2923_v2 }
  0x34   : > { %297 = vst [vmem:[#allocation2 + $0x10] sm:$0xff] %v2924_v3  ;;  %298 = vst [vmem:[#allocation2 + $0x18] sm:$0xff] %v2926_v4 }
  0x35 PF: > { %v301_v5 = vld [vmem:[%s3487_s15] sm:$0xff]  ;;  %v3403_v7 = vmov 0   ;;  %v336_v12 = vld [vmem:[#allocation2 + $0x28] sm:$0xff]  ;;  %v302_v14 = vld [vmem:[%s3487_s15 + $0x8] sm:$0xff]  ;;  %v299_v26 = vlaneseq  ;;  %v3404_v30 = vmov 0.0   ;;  %vm347_vm2 = vcmask 523264  }
  0x36   : > { %2927 = vset.pattern.permute.xlu0 %v3403_v7  ;;  %v316_v11 = vld [vmem:[%s3492_s20] sm:$0xff]  ;;  %v338_v13 = vld [vmem:[#allocation2 + $0x38] sm:$0xff]  ;;  %2928 = vset.pattern.permute.xlu1 %v3403_v7  ;;  %v335_v15 = vld [vmem:[#allocation2 + $0x20] sm:$0xff]  ;;  %s2848_s6 = sshll.u32 %s3443_s19, 4  ;;  %p2851_p4 = scmp.ne.s32.totalorder %s3443_s19, 2 }
  0x37   : > { %304 = vperm.xlu0 %2927, %v301_v5   ;;  %319 = vperm.xlu1 %2928, %v316_v11   ;;  %v337_v16 = vld [vmem:[#allocation2 + $0x30] sm:$0xff]  ;;  %v317_v17 = vld [vmem:[%s3492_s20 + $0x8] sm:$0xff]  ;;  %v340_v18 = vld [vmem:[#allocation2 + $0x48] sm:$0xff]  ;;  %v300_v27 = vand.u32 127, %v299_v26  ;;  %s2445_s7 = sadd.s32 16, %s2848_s6  ;;  %vm2494_vm5 = vcmp.lt.s32.totalorder (!%p2851_p4), %v299_v26, 512 }
  0x38   : > { %v342_v19 = vld [vmem:[#allocation2 + $0x58] sm:$0xff]  ;;  %v339_v20 = vld [vmem:[#allocation2 + $0x40] sm:$0xff]  ;;  %383 = vmatprep.mubr.bf16.mxu0 %v3403_v7  ;;  %v341_v21 = vld [vmem:[#allocation2 + $0x50] sm:$0xff]  ;;  %426 = vmatprep.mubr.bf16.mxu1 %v3403_v7  ;;  %s2450_s8 = sshra.s32 %s2445_s7, 4 }
  0x39   : > { %v344_v22 = vld [vmem:[#allocation2 + $0x68] sm:$0xff]  ;;  %v343_v24 = vld [vmem:[#allocation2 + $0x60] sm:$0xff]  ;;  %s2856_s9 = sshll.u32 %s2450_s8, 5 }
  0x3a   : > { %v346_v23 = vld [vmem:[#allocation2 + $0x78] sm:$0xff]  ;;  %v345_v25 = vld [vmem:[#allocation2 + $0x70] sm:$0xff]  ;;  %s2454_s10 = scalar_lea.vmem [#allocation2], %s2856_s9 }
  0x3b   : > { %v332_v6 = vld [vmem:[#allocation2 + $0x8] sm:$0xff]  ;;  %v334_v8 = vld [vmem:[#allocation2 + $0x18] sm:$0xff]  ;;  %v331_v9 = vld [vmem:[#allocation2] sm:$0xff]  ;;  %307 = vperm.xlu0 %2927, %v302_v14   ;;  %322 = vperm.xlu1 %2928, %v317_v17  }
  0x3c   : > { %351 = vmatprep.subr.bf16.mxu0 %v332_v6  ;;  %v333_v10 = vld [vmem:[#allocation2 + $0x10] sm:$0xff]  ;;  %394 = vmatprep.subr.bf16.mxu1 %v334_v8  ;;  %v2934_v39 = vld [vmem:[#allocation3 + $0xc] ss:$16 sps:$4 sm:$0xff]   ;;  %v2932_v42 = vld [vmem:[#allocation3 + $0x8] ss:$16 sps:$4 sm:$0xff]  }
  0x3d   : > { %352 = vmatpush1.bf16.msra.mxu0 %v331_v9  ;;  %395 = vmatpush1.bf16.msra.mxu1 %v333_v10  ;;  %v2931_v38 = vld [vmem:[#allocation3 + $0x4] ss:$16 sps:$4 sm:$0xff]   ;;  %v2929_v41 = vld [vmem:[#allocation3] ss:$16 sps:$4 sm:$0xff]   ;;  %v2940_v44 = vld [vmem:[#allocation3 + $0x2c] ss:$16 sps:$4 sm:$0xff]  }
  0x3e   : > { %353 = vmatprep.subr.bf16.mxu0 %v336_v12  ;;  %396 = vmatprep.subr.bf16.mxu1 %v338_v13  ;;  %v2937_v43 = vld [vmem:[#allocation3 + $0x24] ss:$16 sps:$4 sm:$0xff]   ;;  %v2935_v45 = vld [vmem:[#allocation3 + $0x20] ss:$16 sps:$4 sm:$0xff]   ;;  %v2938_v46 = vld [vmem:[#allocation3 + $0x28] ss:$16 sps:$4 sm:$0xff]  }
  0x3f   : > { %v2943_v47 = vld [vmem:[#allocation3 + $0x44] ss:$16 sps:$4 sm:$0xff]   ;;  %v2946_v48 = vld [vmem:[#allocation3 + $0x4c] ss:$16 sps:$4 sm:$0xff]   ;;  %v2941_v49 = vld [vmem:[#allocation3 + $0x40] ss:$16 sps:$4 sm:$0xff]  }
  0x40   : > { %v2944_v50 = vld [vmem:[#allocation3 + $0x48] ss:$16 sps:$4 sm:$0xff]   ;;  %v2949_v51 = vld [vmem:[#allocation3 + $0x64] ss:$16 sps:$4 sm:$0xff]   ;;  %v2952_v52 = vld [vmem:[#allocation3 + $0x6c] ss:$16 sps:$4 sm:$0xff]  }
  0x41   : > { %354 = vmatpush1.bf16.msra.mxu0 %v335_v15  ;;  %397 = vmatpush1.bf16.msra.mxu1 %v337_v16  ;;  %v2947_v53 = vld [vmem:[#allocation3 + $0x60] ss:$16 sps:$4 sm:$0xff]   ;;  %v2950_v54 = vld [vmem:[#allocation3 + $0x68] ss:$16 sps:$4 sm:$0xff]   ;;  %v2955_v55 = vld [vmem:[#allocation3 + $0x84] ss:$16 sps:$4 sm:$0xff]  }
  0x42   : > { %355 = vmatprep.subr.bf16.mxu0 %v340_v18  ;;  %398 = vmatprep.subr.bf16.mxu1 %v342_v19  ;;  %v2958_v56 = vld [vmem:[#allocation3 + $0x8c] ss:$16 sps:$4 sm:$0xff]   ;;  %v2953_v57 = vld [vmem:[#allocation3 + $0x80] ss:$16 sps:$4 sm:$0xff]   ;;  %v2956_v58 = vld [vmem:[#allocation3 + $0x88] ss:$16 sps:$4 sm:$0xff]  }
  0x43   : > { %v2961_v59 = vld [vmem:[#allocation3 + $0xa4] ss:$16 sps:$4 sm:$0xff]   ;;  %v2964_v60 = vld [vmem:[#allocation3 + $0xac] ss:$16 sps:$4 sm:$0xff]   ;;  %v2959_v61 = vld [vmem:[#allocation3 + $0xa0] ss:$16 sps:$4 sm:$0xff]  }
  0x44   : > { %v2962_v62 = vld [vmem:[#allocation3 + $0xa8] ss:$16 sps:$4 sm:$0xff]   ;;  %v2967_v63 = vld [vmem:[#allocation3 + $0xc4] ss:$16 sps:$4 sm:$0xff]   ;;  %v2970_v0 = vld [vmem:[#allocation3 + $0xcc] ss:$16 sps:$4 sm:$0xff]  }
  0x45   : > { %356 = vmatpush1.bf16.msra.mxu0 %v339_v20  ;;  %399 = vmatpush1.bf16.msra.mxu1 %v341_v21  ;;  %v2965_v1 = vld [vmem:[#allocation3 + $0xc0] ss:$16 sps:$4 sm:$0xff]   ;;  %v2968_v2 = vld [vmem:[#allocation3 + $0xc8] ss:$16 sps:$4 sm:$0xff]   ;;  %v2973_v3 = vld [vmem:[#allocation3 + $0xe4] ss:$16 sps:$4 sm:$0xff]  }
  0x46   : > { %357 = vmatprep.subr.bf16.mxu0 %v344_v22  ;;  %400 = vmatprep.subr.bf16.mxu1 %v346_v23  ;;  %v2976_v4 = vld [vmem:[#allocation3 + $0xec] ss:$16 sps:$4 sm:$0xff]   ;;  %v2971_v5 = vld [vmem:[#allocation3 + $0xe0] ss:$16 sps:$4 sm:$0xff]   ;;  %v2985_v11 = vld [vmem:[#allocation3 + $0x124] ss:$16 sps:$4 sm:$0xff]  }
  0x47   : > { %v2986_v14 = vld [vmem:[#allocation3 + $0x128] ss:$16 sps:$4 sm:$0xff]   ;;  %v2989_v17 = vld [vmem:[#allocation3 + $0x140] ss:$16 sps:$4 sm:$0xff]  }
  0x49   : > { %358 = vmatpush1.bf16.msra.mxu0 %v343_v24  ;;  %401 = vmatpush1.bf16.msra.mxu1 %v345_v25 }
  0x4a   : > { %444 = vmatprep.subr.bf16.mxu0 %v332_v6  ;;  %487 = vmatprep.subr.bf16.mxu1 %v334_v8  ;;  %v2974_v6 = vld [vmem:[#allocation3 + $0xe8] ss:$16 sps:$4 sm:$0xff]   ;;  %v2982_v8 = vld [vmem:[#allocation3 + $0x10c] ss:$16 sps:$4 sm:$0xff]  }
  0xb6   : > { %v305_v28 = vpop.permute.xlu0 %304  ;;  %v320_v33 = vpop.permute.xlu1 %319 }
  0xb7   : > { %vm309_vm0 = vcmp.eq.s32.totalorder %v300_v27, %v305_v28  ;;  %vm324_vm3 = vcmp.eq.s32.totalorder %v300_v27, %v320_v33  ;;  %v3009_v28 = vld [vmem:[#allocation3 + $0x1a4] ss:$16 sps:$4 sm:$0xff]   ;;  %v3018_v33 = vld [vmem:[#allocation3 + $0x1cc] ss:$16 sps:$4 sm:$0xff]  }
  0xb8   : > { %v2584_v31 = vsel %vm309_vm0, 1.0, %v3404_v30  ;;  %v2586_v36 = vsel %vm324_vm3, 1.0, %v3404_v30 }
  0xba   : > { %v308_v29 = vpop.permute.xlu0 %307  ;;  %v323_v35 = vpop.permute.xlu1 %322 }
  0xbb   : > { %vm310_vm1 = vcmp.eq.s32.totalorder %v300_v27, %v308_v29  ;;  %vm325_vm4 = vcmp.eq.s32.totalorder %v300_v27, %v323_v35  ;;  %v3004_v27 = vld [vmem:[#allocation3 + $0x188] ss:$16 sps:$4 sm:$0xff]   ;;  %v3012_v29 = vld [vmem:[#allocation3 + $0x1ac] ss:$16 sps:$4 sm:$0xff]  }
  0xbc   : > { %v2585_v32 = vsel %vm310_vm1, 1.0, %v3404_v30  ;;  %v2587_v37 = vsel %vm325_vm4, 1.0, %v3404_v30  ;;  %v3007_v30 = vld [vmem:[#allocation3 + $0x1a0] ss:$16 sps:$4 sm:$0xff]   ;;  %v3016_v35 = vld [vmem:[#allocation3 + $0x1c8] ss:$16 sps:$4 sm:$0xff]  }
  0xbd   : > { %v315_v34 = vpack.c.bf16 %v2585_v32, %v2584_v31  ;;  %v330_v40 = vpack.c.bf16 %v2587_v37, %v2586_v36  ;;  %v3010_v31 = vld [vmem:[#allocation3 + $0x1a8] ss:$16 sps:$4 sm:$0xff]   ;;  %v3015_v32 = vld [vmem:[#allocation3 + $0x1c4] ss:$16 sps:$4 sm:$0xff]   ;;  %v3024_v37 = vld [vmem:[#allocation3 + $0x1ec] ss:$16 sps:$4 sm:$0xff]  }
  0xbe   : > { %v3021_v36 = vld [vmem:[#allocation3 + $0x1e4] ss:$16 sps:$4 sm:$0xff]  }
  0xbf   : > { %2588 = vmatmul.mubr.msk.bf16.vlgmr.msra.gmra.mrb[0].mxu0 %vm347_vm2, %v315_v34  ;;  %2589 = vmatmul.mubr.msk.bf16.vlgmr.msra.gmra.mrb[0].mxu1 %vm347_vm2, %v315_v34  ;;  %v3013_v34 = vld [vmem:[#allocation3 + $0x1c0] ss:$16 sps:$4 sm:$0xff]  }
  0xc0   : > { %445 = vmatpush1.bf16.msra.mxu0 %v331_v9  ;;  %488 = vmatpush1.bf16.msra.mxu1 %v333_v10  ;;  %v2977_v9 = vld [vmem:[#allocation3 + $0x100] ss:$16 sps:$4 sm:$0xff]   ;;  %v2980_v10 = vld [vmem:[#allocation3 + $0x108] ss:$16 sps:$4 sm:$0xff]  }
  0xc1   : > { %446 = vmatprep.subr.bf16.mxu0 %v336_v12  ;;  %489 = vmatprep.subr.bf16.mxu1 %v338_v13  ;;  %v2988_v12 = vld [vmem:[#allocation3 + $0x12c] ss:$16 sps:$4 sm:$0xff]   ;;  %v2983_v13 = vld [vmem:[#allocation3 + $0x120] ss:$16 sps:$4 sm:$0xff]  }
  0xc2   : > { %476 = vmatprep.mubr.bf16.mxu0 %v3403_v7  ;;  %519 = vmatprep.mubr.bf16.mxu1 %v3403_v7  ;;  %v2979_v7 = vld [vmem:[#allocation3 + $0x104] ss:$16 sps:$4 sm:$0xff]  }
  0xc4   : > { %447 = vmatpush1.bf16.msra.mxu0 %v335_v15  ;;  %490 = vmatpush1.bf16.msra.mxu1 %v337_v16  ;;  %v2991_v15 = vld [vmem:[#allocation3 + $0x144] ss:$16 sps:$4 sm:$0xff]   ;;  %v2994_v16 = vld [vmem:[#allocation3 + $0x14c] ss:$16 sps:$4 sm:$0xff]  }
  0xc5   : > { %448 = vmatprep.subr.bf16.mxu0 %v340_v18  ;;  %491 = vmatprep.subr.bf16.mxu1 %v342_v19  ;;  %v2992_v18 = vld [vmem:[#allocation3 + $0x148] ss:$16 sps:$4 sm:$0xff]   ;;  %v2997_v19 = vld [vmem:[#allocation3 + $0x164] ss:$16 sps:$4 sm:$0xff]  }
  0xc8   : > { %449 = vmatpush1.bf16.msra.mxu0 %v339_v20  ;;  %492 = vmatpush1.bf16.msra.mxu1 %v341_v21  ;;  %v3000_v20 = vld [vmem:[#allocation3 + $0x16c] ss:$16 sps:$4 sm:$0xff]   ;;  %v2995_v21 = vld [vmem:[#allocation3 + $0x160] ss:$16 sps:$4 sm:$0xff]  }
  0xc9   : > { %450 = vmatprep.subr.bf16.mxu0 %v344_v22  ;;  %493 = vmatprep.subr.bf16.mxu1 %v346_v23  ;;  %v2998_v22 = vld [vmem:[#allocation3 + $0x168] ss:$16 sps:$4 sm:$0xff]   ;;  %v3003_v23 = vld [vmem:[#allocation3 + $0x184] ss:$16 sps:$4 sm:$0xff]  }
  0xcc   : > { %451 = vmatpush1.bf16.msra.mxu0 %v343_v24  ;;  %494 = vmatpush1.bf16.msra.mxu1 %v345_v25  ;;  %v3006_v24 = vld [vmem:[#allocation3 + $0x18c] ss:$16 sps:$4 sm:$0xff]   ;;  %v3001_v25 = vld [vmem:[#allocation3 + $0x180] ss:$16 sps:$4 sm:$0xff]  }
  0xcd   : > { %2092 = vmatprep.subr.bf16.mxu0 %v2931_v38  ;;  %2264 = vmatprep.subr.bf16.mxu1 %v2934_v39  ;;  %v3019_v38 = vld [vmem:[#allocation3 + $0x1e0] ss:$16 sps:$4 sm:$0xff]   ;;  %v3022_v39 = vld [vmem:[#allocation3 + $0x1e8] ss:$16 sps:$4 sm:$0xff]  }
  0xcf   : > { %2590 = vmatmul.mubr.msk.bf16.vlgmr.msra.gmra.mrb[4].mxu0 %vm347_vm2, %v330_v40  ;;  %2591 = vmatmul.mubr.msk.bf16.vlgmr.msra.gmra.mrb[4].mxu1 %vm347_vm2, %v330_v40  ;;  %v3027_v40 = vld [vmem:[#allocation3 + $0x204] ss:$16 sps:$4 sm:$0xff]  }
  0xd0   : > { %2093 = vmatpush1.bf16.msra.mxu0 %v2929_v41  ;;  %2265 = vmatpush1.bf16.msra.mxu1 %v2932_v42  ;;  %v3030_v41 = vld [vmem:[#allocation3 + $0x20c] ss:$16 sps:$4 sm:$0xff]  }
  0xd1   : > { %2094 = vmatprep.subr.bf16.mxu0 %v2937_v43  ;;  %2266 = vmatprep.subr.bf16.mxu1 %v2940_v44 }
  0xd4   : > { %2095 = vmatpush1.bf16.msra.mxu0 %v2935_v45  ;;  %2267 = vmatpush1.bf16.msra.mxu1 %v2938_v46 }
  0xd5   : > { %2096 = vmatprep.subr.bf16.mxu0 %v2943_v47  ;;  %2268 = vmatprep.subr.bf16.mxu1 %v2946_v48 }
  0xd8   : > { %2097 = vmatpush1.bf16.msra.mxu0 %v2941_v49  ;;  %2269 = vmatpush1.bf16.msra.mxu1 %v2944_v50 }
  0xd9   : > { %2098 = vmatprep.subr.bf16.mxu0 %v2949_v51  ;;  %2270 = vmatprep.subr.bf16.mxu1 %v2952_v52 }
  0xdc   : > { %2099 = vmatpush1.bf16.msra.mxu0 %v2947_v53  ;;  %2271 = vmatpush1.bf16.msra.mxu1 %v2950_v54  ;;  %v3025_v54 = vld [vmem:[#allocation3 + $0x200] ss:$16 sps:$4 sm:$0xff]  }
  0xdd   : > { %2100 = vmatprep.subr.bf16.mxu0 %v2955_v55  ;;  %2272 = vmatprep.subr.bf16.mxu1 %v2958_v56  ;;  %v3028_v55 = vld [vmem:[#allocation3 + $0x208] ss:$16 sps:$4 sm:$0xff]   ;;  %v3033_v56 = vld [vmem:[#allocation3 + $0x224] ss:$16 sps:$4 sm:$0xff]  }
  0xe0   : > { %2101 = vmatpush1.bf16.msra.mxu0 %v2953_v57  ;;  %2273 = vmatpush1.bf16.msra.mxu1 %v2956_v58  ;;  %v3036_v57 = vld [vmem:[#allocation3 + $0x22c] ss:$16 sps:$4 sm:$0xff]   ;;  %v3031_v58 = vld [vmem:[#allocation3 + $0x220] ss:$16 sps:$4 sm:$0xff]  }
  0xe1   : > { %2102 = vmatprep.subr.bf16.mxu0 %v2961_v59  ;;  %2274 = vmatprep.subr.bf16.mxu1 %v2964_v60  ;;  %v3034_v59 = vld [vmem:[#allocation3 + $0x228] ss:$16 sps:$4 sm:$0xff]   ;;  %v3039_v60 = vld [vmem:[#allocation3 + $0x244] ss:$16 sps:$4 sm:$0xff]  }
  0xe4   : > { %2103 = vmatpush1.bf16.msra.mxu0 %v2959_v61  ;;  %2275 = vmatpush1.bf16.msra.mxu1 %v2962_v62  ;;  %v3042_v61 = vld [vmem:[#allocation3 + $0x24c] ss:$16 sps:$4 sm:$0xff]   ;;  %v3037_v62 = vld [vmem:[#allocation3 + $0x240] ss:$16 sps:$4 sm:$0xff]  }
  0xe5   : > { %2104 = vmatprep.subr.bf16.mxu0 %v2967_v63  ;;  %2276 = vmatprep.subr.bf16.mxu1 %v2970_v0  ;;  %v3040_v63 = vld [vmem:[#allocation3 + $0x248] ss:$16 sps:$4 sm:$0xff]   ;;  %v3045_v0 = vld [vmem:[#allocation3 + $0x264] ss:$16 sps:$4 sm:$0xff]  }
  0xe8   : > { %2105 = vmatpush1.bf16.msra.mxu0 %v2965_v1  ;;  %2277 = vmatpush1.bf16.msra.mxu1 %v2968_v2  ;;  %v3048_v1 = vld [vmem:[#allocation3 + $0x26c] ss:$16 sps:$4 sm:$0xff]   ;;  %v3043_v2 = vld [vmem:[#allocation3 + $0x260] ss:$16 sps:$4 sm:$0xff]  }
  0xe9   : > { %2106 = vmatprep.subr.bf16.mxu0 %v2973_v3  ;;  %2278 = vmatprep.subr.bf16.mxu1 %v2976_v4  ;;  %v3046_v3 = vld [vmem:[#allocation3 + $0x268] ss:$16 sps:$4 sm:$0xff]  }
  0xec   : > { %2107 = vmatpush1.bf16.msra.mxu0 %v2971_v5  ;;  %2279 = vmatpush1.bf16.msra.mxu1 %v2974_v6  ;;  %v3051_v6 = vld [vmem:[#allocation3 + $0x284] ss:$16 sps:$4 sm:$0xff]  }
  0xed   : > { %2108 = vmatprep.subr.bf16.mxu0 %v2979_v7  ;;  %2280 = vmatprep.subr.bf16.mxu1 %v2982_v8  ;;  %v3054_v7 = vld [vmem:[#allocation3 + $0x28c] ss:$16 sps:$4 sm:$0xff]  }
  0xf0   : > { %2109 = vmatpush1.bf16.msra.mxu0 %v2977_v9  ;;  %2281 = vmatpush1.bf16.msra.mxu1 %v2980_v10 }
  0xf1   : > { %2110 = vmatprep.subr.bf16.mxu0 %v2985_v11  ;;  %2282 = vmatprep.subr.bf16.mxu1 %v2988_v12 }
  0xf4   : > { %2111 = vmatpush1.bf16.msra.mxu0 %v2983_v13  ;;  %2283 = vmatpush1.bf16.msra.mxu1 %v2986_v14 }
  0xf5   : > { %2112 = vmatprep.subr.bf16.mxu0 %v2991_v15  ;;  %2284 = vmatprep.subr.bf16.mxu1 %v2994_v16  ;;  %v3049_v16 = vld [vmem:[#allocation3 + $0x280] ss:$16 sps:$4 sm:$0xff]  }
  0xf8   : > { %2113 = vmatpush1.bf16.msra.mxu0 %v2989_v17  ;;  %2285 = vmatpush1.bf16.msra.mxu1 %v2992_v18  ;;  %v3052_v17 = vld [vmem:[#allocation3 + $0x288] ss:$16 sps:$4 sm:$0xff]  }
  0xf9   : > { %2114 = vmatprep.subr.bf16.mxu0 %v2997_v19  ;;  %2286 = vmatprep.subr.bf16.mxu1 %v3000_v20  ;;  %v3057_v20 = vld [vmem:[#allocation3 + $0x2a4] ss:$16 sps:$4 sm:$0xff]  }
  0xfc   : > { %2115 = vmatpush1.bf16.msra.mxu0 %v2995_v21  ;;  %2287 = vmatpush1.bf16.msra.mxu1 %v2998_v22  ;;  %v3060_v21 = vld [vmem:[#allocation3 + $0x2ac] ss:$16 sps:$4 sm:$0xff]   ;;  %v3055_v22 = vld [vmem:[#allocation3 + $0x2a0] ss:$16 sps:$4 sm:$0xff]  }
  0xfd   : > { %2116 = vmatprep.subr.bf16.mxu0 %v3003_v23  ;;  %2288 = vmatprep.subr.bf16.mxu1 %v3006_v24  ;;  %v3058_v23 = vld [vmem:[#allocation3 + $0x2a8] ss:$16 sps:$4 sm:$0xff]   ;;  %v3063_v24 = vld [vmem:[#allocation3 + $0x2c4] ss:$16 sps:$4 sm:$0xff]  }
 0x100   : > { %2117 = vmatpush1.bf16.msra.mxu0 %v3001_v25  ;;  %2289 = vmatpush1.bf16.msra.mxu1 %v3004_v27  ;;  %v3066_v25 = vld [vmem:[#allocation3 + $0x2cc] ss:$16 sps:$4 sm:$0xff]   ;;  %v3061_v27 = vld [vmem:[#allocation3 + $0x2c0] ss:$16 sps:$4 sm:$0xff]  }
 0x101   : > { %2118 = vmatprep.subr.bf16.mxu0 %v3009_v28  ;;  %2290 = vmatprep.subr.bf16.mxu1 %v3012_v29  ;;  %v3064_v28 = vld [vmem:[#allocation3 + $0x2c8] ss:$16 sps:$4 sm:$0xff]   ;;  %v3069_v29 = vld [vmem:[#allocation3 + $0x2e4] ss:$16 sps:$4 sm:$0xff]  }
 0x104   : > { %2119 = vmatpush1.bf16.msra.mxu0 %v3007_v30  ;;  %2291 = vmatpush1.bf16.msra.mxu1 %v3010_v31  ;;  %v3072_v30 = vld [vmem:[#allocation3 + $0x2ec] ss:$16 sps:$4 sm:$0xff]   ;;  %v3067_v31 = vld [vmem:[#allocation3 + $0x2e0] ss:$16 sps:$4 sm:$0xff]  }
 0x105   : > { %2120 = vmatprep.subr.bf16.mxu0 %v3015_v32  ;;  %2292 = vmatprep.subr.bf16.mxu1 %v3018_v33  ;;  %v3070_v32 = vld [vmem:[#allocation3 + $0x2e8] ss:$16 sps:$4 sm:$0xff]   ;;  %v3075_v33 = vld [vmem:[#allocation3 + $0x304] ss:$16 sps:$4 sm:$0xff]  }
 0x108   : > { %2121 = vmatpush1.bf16.msra.mxu0 %v3013_v34  ;;  %2293 = vmatpush1.bf16.msra.mxu1 %v3016_v35  ;;  %v3078_v34 = vld [vmem:[#allocation3 + $0x30c] ss:$16 sps:$4 sm:$0xff]   ;;  %v3073_v35 = vld [vmem:[#allocation3 + $0x300] ss:$16 sps:$4 sm:$0xff]  }
 0x109   : > { %2122 = vmatprep.subr.bf16.mxu0 %v3021_v36  ;;  %2294 = vmatprep.subr.bf16.mxu1 %v3024_v37  ;;  %v3076_v36 = vld [vmem:[#allocation3 + $0x308] ss:$16 sps:$4 sm:$0xff]   ;;  %v3081_v37 = vld [vmem:[#allocation3 + $0x324] ss:$16 sps:$4 sm:$0xff]  }
 0x10c   : > { %2123 = vmatpush1.bf16.msra.mxu0 %v3019_v38  ;;  %2295 = vmatpush1.bf16.msra.mxu1 %v3022_v39  ;;  %v3084_v38 = vld [vmem:[#allocation3 + $0x32c] ss:$16 sps:$4 sm:$0xff]   ;;  %v3079_v39 = vld [vmem:[#allocation3 + $0x320] ss:$16 sps:$4 sm:$0xff]  }
 0x10d   : > { %2135 = vmatprep.subr.bf16.mxu0 %v3027_v40  ;;  %2307 = vmatprep.subr.bf16.mxu1 %v3030_v41  ;;  %v3082_v40 = vld [vmem:[#allocation3 + $0x328] ss:$16 sps:$4 sm:$0xff]   ;;  %v3087_v41 = vld [vmem:[#allocation3 + $0x344] ss:$16 sps:$4 sm:$0xff]  }
 0x192   : > { %v385_v42 = vpop.f32.mrb[0].mxu0  ;;  %v428_v43 = vpop.f32.mrb[0].mxu1 }
 0x193   : > { %v387_v44 = vpop.f32.mrb[1].mxu0  ;;  %v430_v45 = vpop.f32.mrb[1].mxu1 }
 0x194   : > { %v389_v46 = vpop.f32.mrb[2].mxu0  ;;  %v432_v47 = vpop.f32.mrb[2].mxu1 }
 0x195   : > { %v437_v48 = vpack.c.bf16 %v389_v46, %v385_v42  ;;  %v3523_v49 = vpack.c.bf16 %v432_v47, %v428_v43  ;;  %v391_v50 = vpop.f32.mrb[3].mxu0  ;;  %v434_v51 = vpop.f32.mrb[3].mxu1  ;;  %v3090_v42 = vld [vmem:[#allocation3 + $0x34c] ss:$16 sps:$4 sm:$0xff]   ;;  %v3085_v43 = vld [vmem:[#allocation3 + $0x340] ss:$16 sps:$4 sm:$0xff]  }
 0x196   : > { %v438_v52 = vpack.c.bf16 %v391_v50, %v387_v44  ;;  %v440_v53 = vpack.c.bf16 %v434_v51, %v430_v45  ;;  %v3088_v44 = vld [vmem:[#allocation3 + $0x348] ss:$16 sps:$4 sm:$0xff]   ;;  %v3093_v45 = vld [vmem:[#allocation3 + $0x364] ss:$16 sps:$4 sm:$0xff]   ;;  %v3096_v46 = vld [vmem:[#allocation3 + $0x36c] ss:$16 sps:$4 sm:$0xff]  }
 0x197   : > { %v3091_v47 = vld [vmem:[#allocation3 + $0x360] ss:$16 sps:$4 sm:$0xff]   ;;  %v3099_v50 = vld [vmem:[#allocation3 + $0x384] ss:$16 sps:$4 sm:$0xff]   ;;  %v3102_v51 = vld [vmem:[#allocation3 + $0x38c] ss:$16 sps:$4 sm:$0xff]  }
 0x198   : > { %2124 = vmatprep.mubr.bf16.mxu0 %v438_v52  ;;  %2296 = vmatprep.mubr.bf16.mxu1 %v438_v52  ;;  %v3097_v52 = vld [vmem:[#allocation3 + $0x380] ss:$16 sps:$4 sm:$0xff]  }
 0x199   : > { %2125 = vmatmul.mubr.bf16.vlgmr.msra.gmra.mrb[8].mxu0 %v437_v48  ;;  %2297 = vmatmul.mubr.bf16.vlgmr.msra.gmra.mrb[8].mxu1 %v437_v48  ;;  %v3094_v48 = vld [vmem:[#allocation3 + $0x368] ss:$16 sps:$4 sm:$0xff]  }
 0x19a   : > { %2136 = vmatpush1.bf16.msra.mxu0 %v3025_v54  ;;  %2308 = vmatpush1.bf16.msra.mxu1 %v3028_v55  ;;  %v3105_v54 = vld [vmem:[#allocation3 + $0x3a4] ss:$16 sps:$4 sm:$0xff]   ;;  %v3108_v55 = vld [vmem:[#allocation3 + $0x3ac] ss:$16 sps:$4 sm:$0xff]  }
 0x19b   : > { %2167 = vmatprep.mubr.bf16.mxu0 %v440_v53  ;;  %2339 = vmatprep.mubr.bf16.mxu1 %v440_v53  ;;  %v3100_v53 = vld [vmem:[#allocation3 + $0x388] ss:$16 sps:$4 sm:$0xff]  }
 0x19c   : > { %2137 = vmatprep.subr.bf16.mxu0 %v3033_v56  ;;  %2309 = vmatprep.subr.bf16.mxu1 %v3036_v57  ;;  %v3103_v56 = vld [vmem:[#allocation3 + $0x3a0] ss:$16 sps:$4 sm:$0xff]   ;;  %v3106_v57 = vld [vmem:[#allocation3 + $0x3a8] ss:$16 sps:$4 sm:$0xff]  }
 0x19e   : > { %2138 = vmatpush1.bf16.msra.mxu0 %v3031_v58  ;;  %2310 = vmatpush1.bf16.msra.mxu1 %v3034_v59  ;;  %v3111_v58 = vld [vmem:[#allocation3 + $0x3c4] ss:$16 sps:$4 sm:$0xff]   ;;  %v3114_v59 = vld [vmem:[#allocation3 + $0x3cc] ss:$16 sps:$4 sm:$0xff]  }
 0x19f   : > { %2139 = vmatprep.subr.bf16.mxu0 %v3039_v60  ;;  %2311 = vmatprep.subr.bf16.mxu1 %v3042_v61  ;;  %v3109_v60 = vld [vmem:[#allocation3 + $0x3c0] ss:$16 sps:$4 sm:$0xff]   ;;  %v3112_v61 = vld [vmem:[#allocation3 + $0x3c8] ss:$16 sps:$4 sm:$0xff]  }
 0x1a2   : > { %2140 = vmatpush1.bf16.msra.mxu0 %v3037_v62  ;;  %2312 = vmatpush1.bf16.msra.mxu1 %v3040_v63  ;;  %v478_v4 = vpop.f32.mrb[4].mxu0  ;;  %v521_v5 = vpop.f32.mrb[4].mxu1  ;;  %v3117_v62 = vld [vmem:[#allocation3 + $0x3e4] ss:$16 sps:$4 sm:$0xff]   ;;  %v3120_v63 = vld [vmem:[#allocation3 + $0x3ec] ss:$16 sps:$4 sm:$0xff]  }
 0x1a3   : > { %2141 = vmatprep.subr.bf16.mxu0 %v3045_v0  ;;  %2313 = vmatprep.subr.bf16.mxu1 %v3048_v1  ;;  %v480_v8 = vpop.f32.mrb[5].mxu0  ;;  %v523_v9 = vpop.f32.mrb[5].mxu1  ;;  %v3115_v0 = vld [vmem:[#allocation3 + $0x3e0] ss:$16 sps:$4 sm:$0xff]   ;;  %v3118_v1 = vld [vmem:[#allocation3 + $0x3e8] ss:$16 sps:$4 sm:$0xff]  }
 0x1a4   : > { %v482_v10 = vpop.f32.mrb[6].mxu0  ;;  %v525_v11 = vpop.f32.mrb[6].mxu1 }
 0x1a5   : > { %v3525_v12 = vpack.c.bf16 %v482_v10, %v478_v4  ;;  %v3527_v13 = vpack.c.bf16 %v525_v11, %v521_v5  ;;  %v484_v14 = vpop.f32.mrb[7].mxu0  ;;  %v527_v15 = vpop.f32.mrb[7].mxu1  ;;  %v3121_v4 = vld [vmem:[#allocation3 + $0x400] ss:$16 sps:$4 sm:$0xff]   ;;  %v3124_v5 = vld [vmem:[#allocation3 + $0x408] ss:$16 sps:$4 sm:$0xff]  }
 0x1a6   : > { %2142 = vmatpush1.bf16.msra.mxu0 %v3043_v2  ;;  %2314 = vmatpush1.bf16.msra.mxu1 %v3046_v3  ;;  %v3529_v18 = vpack.c.bf16 %v484_v14, %v480_v8  ;;  %v3531_v19 = vpack.c.bf16 %v527_v15, %v523_v9  ;;  %v3123_v2 = vld [vmem:[#allocation3 + $0x404] ss:$16 sps:$4 sm:$0xff]   ;;  %v3126_v3 = vld [vmem:[#allocation3 + $0x40c] ss:$16 sps:$4 sm:$0xff]   ;;  %v3127_v8 = vld [vmem:[#allocation3 + $0x420] ss:$16 sps:$4 sm:$0xff]  }
 0x1a7   : > { %2143 = vmatprep.subr.bf16.mxu0 %v3051_v6  ;;  %2315 = vmatprep.subr.bf16.mxu1 %v3054_v7  ;;  %v3129_v6 = vld [vmem:[#allocation3 + $0x424] ss:$16 sps:$4 sm:$0xff]   ;;  %v3132_v7 = vld [vmem:[#allocation3 + $0x42c] ss:$16 sps:$4 sm:$0xff]   ;;  %v3130_v9 = vld [vmem:[#allocation3 + $0x428] ss:$16 sps:$4 sm:$0xff]  }
 0x1a8   : > { %v3135_v10 = vld [vmem:[#allocation3 + $0x444] ss:$16 sps:$4 sm:$0xff]   ;;  %v3138_v11 = vld [vmem:[#allocation3 + $0x44c] ss:$16 sps:$4 sm:$0xff]   ;;  %v3133_v14 = vld [vmem:[#allocation3 + $0x440] ss:$16 sps:$4 sm:$0xff]  }
 0x1a9   : > { %v3136_v15 = vld [vmem:[#allocation3 + $0x448] ss:$16 sps:$4 sm:$0xff]  }
 0x1aa   : > { %2144 = vmatpush1.bf16.msra.mxu0 %v3049_v16  ;;  %2316 = vmatpush1.bf16.msra.mxu1 %v3052_v17  ;;  %v3141_v16 = vld [vmem:[#allocation3 + $0x464] ss:$16 sps:$4 sm:$0xff]   ;;  %v3139_v17 = vld [vmem:[#allocation3 + $0x460] ss:$16 sps:$4 sm:$0xff]  }
 0x1ab   : > { %2145 = vmatprep.subr.bf16.mxu0 %v3057_v20  ;;  %2317 = vmatprep.subr.bf16.mxu1 %v3060_v21  ;;  %v3142_v20 = vld [vmem:[#allocation3 + $0x468] ss:$16 sps:$4 sm:$0xff]   ;;  %v3147_v21 = vld [vmem:[#allocation3 + $0x484] ss:$16 sps:$4 sm:$0xff]  }
 0x1ae   : > { %2146 = vmatpush1.bf16.msra.mxu0 %v3055_v22  ;;  %2318 = vmatpush1.bf16.msra.mxu1 %v3058_v23  ;;  %v3150_v22 = vld [vmem:[#allocation3 + $0x48c] ss:$16 sps:$4 sm:$0xff]   ;;  %v3145_v23 = vld [vmem:[#allocation3 + $0x480] ss:$16 sps:$4 sm:$0xff]  }
 0x1af   : > { %2147 = vmatprep.subr.bf16.mxu0 %v3063_v24  ;;  %2319 = vmatprep.subr.bf16.mxu1 %v3066_v25  ;;  %v3153_v24 = vld [vmem:[#allocation3 + $0x4a4] ss:$16 sps:$4 sm:$0xff]   ;;  %v3156_v25 = vld [vmem:[#allocation3 + $0x4ac] ss:$16 sps:$4 sm:$0xff]  }
 0x1b2   : > { %2148 = vmatpush1.bf16.msra.mxu0 %v3061_v27  ;;  %2320 = vmatpush1.bf16.msra.mxu1 %v3064_v28  ;;  %v3151_v27 = vld [vmem:[#allocation3 + $0x4a0] ss:$16 sps:$4 sm:$0xff]   ;;  %v3154_v28 = vld [vmem:[#allocation3 + $0x4a8] ss:$16 sps:$4 sm:$0xff]  }
 0x1b3   : > { %2149 = vmatprep.subr.bf16.mxu0 %v3069_v29  ;;  %2321 = vmatprep.subr.bf16.mxu1 %v3072_v30  ;;  %v3159_v29 = vld [vmem:[#allocation3 + $0x4c4] ss:$16 sps:$4 sm:$0xff]   ;;  %v3162_v30 = vld [vmem:[#allocation3 + $0x4cc] ss:$16 sps:$4 sm:$0xff]  }
 0x1b6   : > { %2150 = vmatpush1.bf16.msra.mxu0 %v3067_v31  ;;  %2322 = vmatpush1.bf16.msra.mxu1 %v3070_v32  ;;  %v3157_v31 = vld [vmem:[#allocation3 + $0x4c0] ss:$16 sps:$4 sm:$0xff]   ;;  %v3160_v32 = vld [vmem:[#allocation3 + $0x4c8] ss:$16 sps:$4 sm:$0xff]  }
 0x1b7   : > { %2151 = vmatprep.subr.bf16.mxu0 %v3075_v33  ;;  %2323 = vmatprep.subr.bf16.mxu1 %v3078_v34  ;;  %v3165_v33 = vld [vmem:[#allocation3 + $0x4e4] ss:$16 sps:$4 sm:$0xff]   ;;  %v3168_v34 = vld [vmem:[#allocation3 + $0x4ec] ss:$16 sps:$4 sm:$0xff]  }
 0x1ba   : > { %2152 = vmatpush1.bf16.msra.mxu0 %v3073_v35  ;;  %2324 = vmatpush1.bf16.msra.mxu1 %v3076_v36  ;;  %v3163_v35 = vld [vmem:[#allocation3 + $0x4e0] ss:$16 sps:$4 sm:$0xff]   ;;  %v3166_v36 = vld [vmem:[#allocation3 + $0x4e8] ss:$16 sps:$4 sm:$0xff]  }
 0x1bb   : > { %2153 = vmatprep.subr.bf16.mxu0 %v3081_v37  ;;  %2325 = vmatprep.subr.bf16.mxu1 %v3084_v38  ;;  %v3171_v37 = vld [vmem:[#allocation3 + $0x504] ss:$16 sps:$4 sm:$0xff]   ;;  %v3174_v38 = vld [vmem:[#allocation3 + $0x50c] ss:$16 sps:$4 sm:$0xff]  }
 0x1be   : > { %2154 = vmatpush1.bf16.msra.mxu0 %v3079_v39  ;;  %2326 = vmatpush1.bf16.msra.mxu1 %v3082_v40  ;;  %v3169_v39 = vld [vmem:[#allocation3 + $0x500] ss:$16 sps:$4 sm:$0xff]   ;;  %v3172_v40 = vld [vmem:[#allocation3 + $0x508] ss:$16 sps:$4 sm:$0xff]  }
 0x1bf   : > { %2155 = vmatprep.subr.bf16.mxu0 %v3087_v41  ;;  %2327 = vmatprep.subr.bf16.mxu1 %v3090_v42  ;;  %v3177_v41 = vld [vmem:[#allocation3 + $0x524] ss:$16 sps:$4 sm:$0xff]   ;;  %v3180_v42 = vld [vmem:[#allocation3 + $0x52c] ss:$16 sps:$4 sm:$0xff]  }
 0x1c2   : > { %2156 = vmatpush1.bf16.msra.mxu0 %v3085_v43  ;;  %2328 = vmatpush1.bf16.msra.mxu1 %v3088_v44  ;;  %v3175_v43 = vld [vmem:[#allocation3 + $0x520] ss:$16 sps:$4 sm:$0xff]   ;;  %v3178_v44 = vld [vmem:[#allocation3 + $0x528] ss:$16 sps:$4 sm:$0xff]  }
 0x1c3   : > { %2157 = vmatprep.subr.bf16.mxu0 %v3093_v45  ;;  %2329 = vmatprep.subr.bf16.mxu1 %v3096_v46  ;;  %v3183_v45 = vld [vmem:[#allocation3 + $0x544] ss:$16 sps:$4 sm:$0xff]   ;;  %v3186_v46 = vld [vmem:[#allocation3 + $0x54c] ss:$16 sps:$4 sm:$0xff]  }
 0x1c6   : > { %2158 = vmatpush1.bf16.msra.mxu0 %v3091_v47  ;;  %2330 = vmatpush1.bf16.msra.mxu1 %v3094_v48  ;;  %v3181_v47 = vld [vmem:[#allocation3 + $0x540] ss:$16 sps:$4 sm:$0xff]   ;;  %v3184_v48 = vld [vmem:[#allocation3 + $0x548] ss:$16 sps:$4 sm:$0xff]  }
 0x1c7   : > { %2159 = vmatprep.subr.bf16.mxu0 %v3099_v50  ;;  %2331 = vmatprep.subr.bf16.mxu1 %v3102_v51  ;;  %v3189_v50 = vld [vmem:[#allocation3 + $0x564] ss:$16 sps:$4 sm:$0xff]   ;;  %v3192_v51 = vld [vmem:[#allocation3 + $0x56c] ss:$16 sps:$4 sm:$0xff]  }
 0x1ca   : > { %2160 = vmatpush1.bf16.msra.mxu0 %v3097_v52  ;;  %2332 = vmatpush1.bf16.msra.mxu1 %v3100_v53  ;;  %v3187_v52 = vld [vmem:[#allocation3 + $0x560] ss:$16 sps:$4 sm:$0xff]   ;;  %v3190_v53 = vld [vmem:[#allocation3 + $0x568] ss:$16 sps:$4 sm:$0xff]  }
 0x1cb   : > { %2161 = vmatprep.subr.bf16.mxu0 %v3105_v54  ;;  %2333 = vmatprep.subr.bf16.mxu1 %v3108_v55  ;;  %v3195_v54 = vld [vmem:[#allocation3 + $0x584] ss:$16 sps:$4 sm:$0xff]   ;;  %v3198_v55 = vld [vmem:[#allocation3 + $0x58c] ss:$16 sps:$4 sm:$0xff]  }
 0x1ce   : > { %2162 = vmatpush1.bf16.msra.mxu0 %v3103_v56  ;;  %2334 = vmatpush1.bf16.msra.mxu1 %v3106_v57  ;;  %v3193_v56 = vld [vmem:[#allocation3 + $0x580] ss:$16 sps:$4 sm:$0xff]   ;;  %v3196_v57 = vld [vmem:[#allocation3 + $0x588] ss:$16 sps:$4 sm:$0xff]  }
 0x1cf   : > { %2163 = vmatprep.subr.bf16.mxu0 %v3111_v58  ;;  %2335 = vmatprep.subr.bf16.mxu1 %v3114_v59  ;;  %v3201_v58 = vld [vmem:[#allocation3 + $0x5a4] ss:$16 sps:$4 sm:$0xff]   ;;  %v3204_v59 = vld [vmem:[#allocation3 + $0x5ac] ss:$16 sps:$4 sm:$0xff]  }
 0x1d2   : > { %2164 = vmatpush1.bf16.msra.mxu0 %v3109_v60  ;;  %2336 = vmatpush1.bf16.msra.mxu1 %v3112_v61  ;;  %v3199_v60 = vld [vmem:[#allocation3 + $0x5a0] ss:$16 sps:$4 sm:$0xff]   ;;  %v3202_v61 = vld [vmem:[#allocation3 + $0x5a8] ss:$16 sps:$4 sm:$0xff]  }
 0x1d3   : > { %2165 = vmatprep.subr.bf16.mxu0 %v3117_v62  ;;  %2337 = vmatprep.subr.bf16.mxu1 %v3120_v63  ;;  %v3207_v62 = vld [vmem:[#allocation3 + $0x5c4] ss:$16 sps:$4 sm:$0xff]   ;;  %v3210_v63 = vld [vmem:[#allocation3 + $0x5cc] ss:$16 sps:$4 sm:$0xff]  }
 0x1d6   : > { %2166 = vmatpush1.bf16.msra.mxu0 %v3115_v0  ;;  %2338 = vmatpush1.bf16.msra.mxu1 %v3118_v1  ;;  %v3205_v0 = vld [vmem:[#allocation3 + $0x5c0] ss:$16 sps:$4 sm:$0xff]   ;;  %v3208_v1 = vld [vmem:[#allocation3 + $0x5c8] ss:$16 sps:$4 sm:$0xff]  }
 0x1d7   : > { %2178 = vmatprep.subr.bf16.mxu0 %v3123_v2  ;;  %2350 = vmatprep.subr.bf16.mxu1 %v3126_v3  ;;  %v3213_v2 = vld [vmem:[#allocation3 + $0x5e4] ss:$16 sps:$4 sm:$0xff]   ;;  %v3216_v3 = vld [vmem:[#allocation3 + $0x5ec] ss:$16 sps:$4 sm:$0xff]  }
 0x1d9   : > { %2168 = vmatmul.mubr.bf16.vlgmr.msra.gmra.mrb[8].mxu0 %v3523_v49  ;;  %2340 = vmatmul.mubr.bf16.vlgmr.msra.gmra.mrb[8].mxu1 %v3523_v49  ;;  %v3144_v49 = vld [vmem:[#allocation3 + $0x46c] ss:$16 sps:$4 sm:$0xff]  }
 0x1da   : > { %2179 = vmatpush1.bf16.msra.mxu0 %v3121_v4  ;;  %2351 = vmatpush1.bf16.msra.mxu1 %v3124_v5  ;;  %v3211_v4 = vld [vmem:[#allocation3 + $0x5e0] ss:$16 sps:$4 sm:$0xff]   ;;  %v3214_v5 = vld [vmem:[#allocation3 + $0x5e8] ss:$16 sps:$4 sm:$0xff]  }
 0x1db   : > { %2180 = vmatprep.subr.bf16.mxu0 %v3129_v6  ;;  %2352 = vmatprep.subr.bf16.mxu1 %v3132_v7  ;;  %v3219_v6 = vld [vmem:[#allocation3 + $0x604] ss:$16 sps:$4 sm:$0xff]   ;;  %v3222_v7 = vld [vmem:[#allocation3 + $0x60c] ss:$16 sps:$4 sm:$0xff]  }
 0x1dc   : > { %2210 = vmatprep.mubr.bf16.mxu0 %v3529_v18  ;;  %2382 = vmatprep.mubr.bf16.mxu1 %v3529_v18  ;;  %v3148_v18 = vld [vmem:[#allocation3 + $0x488] ss:$16 sps:$4 sm:$0xff]  }
 0x1de   : > { %2181 = vmatpush1.bf16.msra.mxu0 %v3127_v8  ;;  %2353 = vmatpush1.bf16.msra.mxu1 %v3130_v9  ;;  %v3217_v8 = vld [vmem:[#allocation3 + $0x600] ss:$16 sps:$4 sm:$0xff]   ;;  %v3220_v9 = vld [vmem:[#allocation3 + $0x608] ss:$16 sps:$4 sm:$0xff]  }
 0x1df   : > { %2182 = vmatprep.subr.bf16.mxu0 %v3135_v10  ;;  %2354 = vmatprep.subr.bf16.mxu1 %v3138_v11  ;;  %v3225_v10 = vld [vmem:[#allocation3 + $0x624] ss:$16 sps:$4 sm:$0xff]   ;;  %v3228_v11 = vld [vmem:[#allocation3 + $0x62c] ss:$16 sps:$4 sm:$0xff]  }
 0x1e2   : > { %2183 = vmatpush1.bf16.msra.mxu0 %v3133_v14  ;;  %2355 = vmatpush1.bf16.msra.mxu1 %v3136_v15  ;;  %v3223_v14 = vld [vmem:[#allocation3 + $0x620] ss:$16 sps:$4 sm:$0xff]   ;;  %v3226_v15 = vld [vmem:[#allocation3 + $0x628] ss:$16 sps:$4 sm:$0xff]  }
 0x1e3   : > { %2184 = vmatprep.subr.bf16.mxu0 %v3141_v16  ;;  %2356 = vmatprep.subr.bf16.mxu1 %v3144_v49  ;;  %v3231_v16 = vld [vmem:[#allocation3 + $0x644] ss:$16 sps:$4 sm:$0xff]   ;;  %v3234_v49 = vld [vmem:[#allocation3 + $0x64c] ss:$16 sps:$4 sm:$0xff]  }
 0x1e6   : > { %2185 = vmatpush1.bf16.msra.mxu0 %v3139_v17  ;;  %2357 = vmatpush1.bf16.msra.mxu1 %v3142_v20  ;;  %v3229_v17 = vld [vmem:[#allocation3 + $0x640] ss:$16 sps:$4 sm:$0xff]   ;;  %v3232_v20 = vld [vmem:[#allocation3 + $0x648] ss:$16 sps:$4 sm:$0xff]  }
 0x1e7   : > { %2186 = vmatprep.subr.bf16.mxu0 %v3147_v21  ;;  %2358 = vmatprep.subr.bf16.mxu1 %v3150_v22  ;;  %v3237_v21 = vld [vmem:[#allocation3 + $0x664] ss:$16 sps:$4 sm:$0xff]   ;;  %v3235_v22 = vld [vmem:[#allocation3 + $0x660] ss:$16 sps:$4 sm:$0xff]  }
 0x1ea   : > { %2187 = vmatpush1.bf16.msra.mxu0 %v3145_v23  ;;  %2359 = vmatpush1.bf16.msra.mxu1 %v3148_v18  ;;  %v3238_v23 = vld [vmem:[#allocation3 + $0x668] ss:$16 sps:$4 sm:$0xff]   ;;  %v3243_v18 = vld [vmem:[#allocation3 + $0x684] ss:$16 sps:$4 sm:$0xff]  }
 0x1eb   : > { %2188 = vmatprep.subr.bf16.mxu0 %v3153_v24  ;;  %2360 = vmatprep.subr.bf16.mxu1 %v3156_v25  ;;  %v3241_v24 = vld [vmem:[#allocation3 + $0x680] ss:$16 sps:$4 sm:$0xff]   ;;  %v3244_v25 = vld [vmem:[#allocation3 + $0x688] ss:$16 sps:$4 sm:$0xff]  }
 0x1ee   : > { %2189 = vmatpush1.bf16.msra.mxu0 %v3151_v27  ;;  %2361 = vmatpush1.bf16.msra.mxu1 %v3154_v28  ;;  %v3249_v27 = vld [vmem:[#allocation3 + $0x6a4] ss:$16 sps:$4 sm:$0xff]   ;;  %v3252_v28 = vld [vmem:[#allocation3 + $0x6ac] ss:$16 sps:$4 sm:$0xff]  }
 0x1ef   : > { %2190 = vmatprep.subr.bf16.mxu0 %v3159_v29  ;;  %2362 = vmatprep.subr.bf16.mxu1 %v3162_v30  ;;  %v3247_v29 = vld [vmem:[#allocation3 + $0x6a0] ss:$16 sps:$4 sm:$0xff]   ;;  %v3250_v30 = vld [vmem:[#allocation3 + $0x6a8] ss:$16 sps:$4 sm:$0xff]  }
 0x1f2   : > { %2191 = vmatpush1.bf16.msra.mxu0 %v3157_v31  ;;  %2363 = vmatpush1.bf16.msra.mxu1 %v3160_v32  ;;  %v3255_v31 = vld [vmem:[#allocation3 + $0x6c4] ss:$16 sps:$4 sm:$0xff]   ;;  %v3258_v32 = vld [vmem:[#allocation3 + $0x6cc] ss:$16 sps:$4 sm:$0xff]  }
 0x1f3   : > { %2192 = vmatprep.subr.bf16.mxu0 %v3165_v33  ;;  %2364 = vmatprep.subr.bf16.mxu1 %v3168_v34  ;;  %v3253_v33 = vld [vmem:[#allocation3 + $0x6c0] ss:$16 sps:$4 sm:$0xff]   ;;  %v3256_v34 = vld [vmem:[#allocation3 + $0x6c8] ss:$16 sps:$4 sm:$0xff]  }
 0x1f6   : > { %2193 = vmatpush1.bf16.msra.mxu0 %v3163_v35  ;;  %2365 = vmatpush1.bf16.msra.mxu1 %v3166_v36  ;;  %v3261_v35 = vld [vmem:[#allocation3 + $0x6e4] ss:$16 sps:$4 sm:$0xff]   ;;  %v3264_v36 = vld [vmem:[#allocation3 + $0x6ec] ss:$16 sps:$4 sm:$0xff]  }
 0x1f7   : > { %2194 = vmatprep.subr.bf16.mxu0 %v3171_v37  ;;  %2366 = vmatprep.subr.bf16.mxu1 %v3174_v38  ;;  %v3259_v37 = vld [vmem:[#allocation3 + $0x6e0] ss:$16 sps:$4 sm:$0xff]   ;;  %v3262_v38 = vld [vmem:[#allocation3 + $0x6e8] ss:$16 sps:$4 sm:$0xff]  }
 0x1fa   : > { %2195 = vmatpush1.bf16.msra.mxu0 %v3169_v39  ;;  %2367 = vmatpush1.bf16.msra.mxu1 %v3172_v40  ;;  %v3267_v39 = vld [vmem:[#allocation3 + $0x704] ss:$16 sps:$4 sm:$0xff]   ;;  %v3270_v40 = vld [vmem:[#allocation3 + $0x70c] ss:$16 sps:$4 sm:$0xff]  }
 0x1fb   : > { %2196 = vmatprep.subr.bf16.mxu0 %v3177_v41  ;;  %2368 = vmatprep.subr.bf16.mxu1 %v3180_v42  ;;  %v3265_v41 = vld [vmem:[#allocation3 + $0x700] ss:$16 sps:$4 sm:$0xff]   ;;  %v3268_v42 = vld [vmem:[#allocation3 + $0x708] ss:$16 sps:$4 sm:$0xff]  }
 0x1fe   : > { %2197 = vmatpush1.bf16.msra.mxu0 %v3175_v43  ;;  %2369 = vmatpush1.bf16.msra.mxu1 %v3178_v44  ;;  %v3273_v43 = vld [vmem:[#allocation3 + $0x724] ss:$16 sps:$4 sm:$0xff]   ;;  %v3276_v44 = vld [vmem:[#allocation3 + $0x72c] ss:$16 sps:$4 sm:$0xff]  }
 0x1ff   : > { %2198 = vmatprep.subr.bf16.mxu0 %v3183_v45  ;;  %2370 = vmatprep.subr.bf16.mxu1 %v3186_v46  ;;  %v3271_v45 = vld [vmem:[#allocation3 + $0x720] ss:$16 sps:$4 sm:$0xff]   ;;  %v3274_v46 = vld [vmem:[#allocation3 + $0x728] ss:$16 sps:$4 sm:$0xff]  }
 0x202   : > { %2199 = vmatpush1.bf16.msra.mxu0 %v3181_v47  ;;  %2371 = vmatpush1.bf16.msra.mxu1 %v3184_v48  ;;  %v3279_v47 = vld [vmem:[#allocation3 + $0x744] ss:$16 sps:$4 sm:$0xff]   ;;  %v3282_v48 = vld [vmem:[#allocation3 + $0x74c] ss:$16 sps:$4 sm:$0xff]  }
 0x203   : > { %2200 = vmatprep.subr.bf16.mxu0 %v3189_v50  ;;  %2372 = vmatprep.subr.bf16.mxu1 %v3192_v51  ;;  %v3277_v50 = vld [vmem:[#allocation3 + $0x740] ss:$16 sps:$4 sm:$0xff]   ;;  %v3280_v51 = vld [vmem:[#allocation3 + $0x748] ss:$16 sps:$4 sm:$0xff]  }
 0x206   : > { %2201 = vmatpush1.bf16.msra.mxu0 %v3187_v52  ;;  %2373 = vmatpush1.bf16.msra.mxu1 %v3190_v53  ;;  %v3285_v52 = vld [vmem:[#allocation3 + $0x764] ss:$16 sps:$4 sm:$0xff]   ;;  %v3288_v53 = vld [vmem:[#allocation3 + $0x76c] ss:$16 sps:$4 sm:$0xff]  }
 0x207   : > { %2202 = vmatprep.subr.bf16.mxu0 %v3195_v54  ;;  %2374 = vmatprep.subr.bf16.mxu1 %v3198_v55  ;;  %v3283_v54 = vld [vmem:[#allocation3 + $0x760] ss:$16 sps:$4 sm:$0xff]   ;;  %v3286_v55 = vld [vmem:[#allocation3 + $0x768] ss:$16 sps:$4 sm:$0xff]  }
 0x20a   : > { %2203 = vmatpush1.bf16.msra.mxu0 %v3193_v56  ;;  %2375 = vmatpush1.bf16.msra.mxu1 %v3196_v57  ;;  %v3291_v56 = vld [vmem:[#allocation3 + $0x784] ss:$16 sps:$4 sm:$0xff]   ;;  %v3294_v57 = vld [vmem:[#allocation3 + $0x78c] ss:$16 sps:$4 sm:$0xff]  }
 0x20b   : > { %2204 = vmatprep.subr.bf16.mxu0 %v3201_v58  ;;  %2376 = vmatprep.subr.bf16.mxu1 %v3204_v59  ;;  %v3289_v58 = vld [vmem:[#allocation3 + $0x780] ss:$16 sps:$4 sm:$0xff]   ;;  %v3292_v59 = vld [vmem:[#allocation3 + $0x788] ss:$16 sps:$4 sm:$0xff]  }
 0x20e   : > { %2205 = vmatpush1.bf16.msra.mxu0 %v3199_v60  ;;  %2377 = vmatpush1.bf16.msra.mxu1 %v3202_v61  ;;  %v3297_v60 = vld [vmem:[#allocation3 + $0x7a4] ss:$16 sps:$4 sm:$0xff]   ;;  %v3300_v61 = vld [vmem:[#allocation3 + $0x7ac] ss:$16 sps:$4 sm:$0xff]  }
 0x20f   : > { %2206 = vmatprep.subr.bf16.mxu0 %v3207_v62  ;;  %2378 = vmatprep.subr.bf16.mxu1 %v3210_v63  ;;  %v3295_v62 = vld [vmem:[#allocation3 + $0x7a0] ss:$16 sps:$4 sm:$0xff]   ;;  %v3298_v63 = vld [vmem:[#allocation3 + $0x7a8] ss:$16 sps:$4 sm:$0xff]  }
 0x212   : > { %2207 = vmatpush1.bf16.msra.mxu0 %v3205_v0  ;;  %2379 = vmatpush1.bf16.msra.mxu1 %v3208_v1  ;;  %v3303_v0 = vld [vmem:[#allocation3 + $0x7c4] ss:$16 sps:$4 sm:$0xff]   ;;  %v3306_v1 = vld [vmem:[#allocation3 + $0x7cc] ss:$16 sps:$4 sm:$0xff]  }
 0x213   : > { %2208 = vmatprep.subr.bf16.mxu0 %v3213_v2  ;;  %2380 = vmatprep.subr.bf16.mxu1 %v3216_v3  ;;  %v3301_v2 = vld [vmem:[#allocation3 + $0x7c0] ss:$16 sps:$4 sm:$0xff]   ;;  %v3304_v3 = vld [vmem:[#allocation3 + $0x7c8] ss:$16 sps:$4 sm:$0xff]  }
 0x216   : > { %2209 = vmatpush1.bf16.msra.mxu0 %v3211_v4  ;;  %2381 = vmatpush1.bf16.msra.mxu1 %v3214_v5  ;;  %v3309_v4 = vld [vmem:[#allocation3 + $0x7e4] ss:$16 sps:$4 sm:$0xff]   ;;  %v3312_v5 = vld [vmem:[#allocation3 + $0x7ec] ss:$16 sps:$4 sm:$0xff]  }
 0x217   : > { %2221 = vmatprep.subr.bf16.mxu0 %v3219_v6  ;;  %2393 = vmatprep.subr.bf16.mxu1 %v3222_v7  ;;  %v3307_v6 = vld [vmem:[#allocation3 + $0x7e0] ss:$16 sps:$4 sm:$0xff]   ;;  %v3310_v7 = vld [vmem:[#allocation3 + $0x7e8] ss:$16 sps:$4 sm:$0xff]  }
 0x219   : > { %2211 = vmatmul.mubr.bf16.vlgmr.msra.gmra.mrb[8].mxu0 %v3525_v12  ;;  %2383 = vmatmul.mubr.bf16.vlgmr.msra.gmra.mrb[8].mxu1 %v3525_v12  ;;  %v3240_v12 = vld [vmem:[#allocation3 + $0x66c] ss:$16 sps:$4 sm:$0xff]  }
 0x21a   : > { %2222 = vmatpush1.bf16.msra.mxu0 %v3217_v8  ;;  %2253 = vmatprep.mubr.bf16.mxu0 %v3531_v19  ;;  %v793_v8 = vshrl.u32 %v299_v26, 7 }
 0x21b   : > { %2394 = vmatpush1.bf16.msra.mxu1 %v3220_v9  ;;  %2425 = vmatprep.mubr.bf16.mxu1 %v3531_v19  ;;  %v3246_v19 = vld [vmem:[#allocation3 + $0x68c] ss:$16 sps:$4 sm:$0xff]  }
 0x21c   : > { %2223 = vmatprep.subr.bf16.mxu0 %v3225_v10  ;;  %2395 = vmatprep.subr.bf16.mxu1 %v3228_v11  ;;  %v794_v9 = vsub.s32 0, %v793_v8  ;;  %v790_v10 = vld [vmem:[%s3580_s4] sm:$0xf]  ;;  %v802_v11 = vsub.s32 2, %v793_v8 }
 0x21e   : > { %2224 = vmatpush1.bf16.msra.mxu0 %v3223_v14  ;;  %v798_v14 = vsub.s32 1, %v793_v8 }
 0x21f   : > { %2396 = vmatpush1.bf16.msra.mxu1 %v3226_v15  ;;  %2225 = vmatprep.subr.bf16.mxu0 %v3231_v16  ;;  %v806_v15 = vsub.s32 3, %v793_v8  ;;  %v795_v16 = vrot.slane %v790_v10, %v794_v9 }
 0x220   : > { %2397 = vmatprep.subr.bf16.mxu1 %v3234_v49  ;;  %v803_v49 = vrot.slane %v790_v10, %v802_v11 }
 0x222   : > { %2226 = vmatpush1.bf16.msra.mxu0 %v3229_v17  ;;  %v799_v17 = vrot.slane %v790_v10, %v798_v14 }
 0x223   : > { %2398 = vmatpush1.bf16.msra.mxu1 %v3232_v20  ;;  %2227 = vmatprep.subr.bf16.mxu0 %v3237_v21  ;;  %v807_v20 = vrot.slane %v790_v10, %v806_v15 }
 0x224   : > { %2399 = vmatprep.subr.bf16.mxu1 %v3240_v12 }
 0x226   : > { %2228 = vmatpush1.bf16.msra.mxu0 %v3235_v22 }
 0x227   : > { %2400 = vmatpush1.bf16.msra.mxu1 %v3238_v23  ;;  %2229 = vmatprep.subr.bf16.mxu0 %v3243_v18 }
 0x228   : > { %2401 = vmatprep.subr.bf16.mxu1 %v3246_v19 }
 0x22a   : > { %2230 = vmatpush1.bf16.msra.mxu0 %v3241_v24 }
 0x22b   : > { %2402 = vmatpush1.bf16.msra.mxu1 %v3244_v25  ;;  %2231 = vmatprep.subr.bf16.mxu0 %v3249_v27 }
 0x22c   : > { %2403 = vmatprep.subr.bf16.mxu1 %v3252_v28 }
 0x22e   : > { %2232 = vmatpush1.bf16.msra.mxu0 %v3247_v29 }
 0x22f   : > { %2404 = vmatpush1.bf16.msra.mxu1 %v3250_v30  ;;  %2233 = vmatprep.subr.bf16.mxu0 %v3255_v31 }
 0x230   : > { %2405 = vmatprep.subr.bf16.mxu1 %v3258_v32 }
 0x232   : > { %2234 = vmatpush1.bf16.msra.mxu0 %v3253_v33 }
 0x233   : > { %2406 = vmatpush1.bf16.msra.mxu1 %v3256_v34  ;;  %2235 = vmatprep.subr.bf16.mxu0 %v3261_v35 }
 0x234   : > { %2407 = vmatprep.subr.bf16.mxu1 %v3264_v36 }
 0x236   : > { %2236 = vmatpush1.bf16.msra.mxu0 %v3259_v37 }
 0x237   : > { %2408 = vmatpush1.bf16.msra.mxu1 %v3262_v38  ;;  %2237 = vmatprep.subr.bf16.mxu0 %v3267_v39 }
 0x238   : > { %2409 = vmatprep.subr.bf16.mxu1 %v3270_v40 }
 0x23a   : > { %2238 = vmatpush1.bf16.msra.mxu0 %v3265_v41 }
 0x23b   : > { %2410 = vmatpush1.bf16.msra.mxu1 %v3268_v42  ;;  %2239 = vmatprep.subr.bf16.mxu0 %v3273_v43 }
 0x23c   : > { %2411 = vmatprep.subr.bf16.mxu1 %v3276_v44 }
 0x23e   : > { %2240 = vmatpush1.bf16.msra.mxu0 %v3271_v45 }
 0x23f   : > { %2412 = vmatpush1.bf16.msra.mxu1 %v3274_v46  ;;  %2241 = vmatprep.subr.bf16.mxu0 %v3279_v47  ;;  %v3405_v46 = vmov (!%p2851_p4), 1966171168  }
 0x240   : > { %2413 = vmatprep.subr.bf16.mxu1 %v3282_v48  ;;  %v2470_v47 = vunpack.c.l.s4 (!%p2851_p4), %v3405_v46 }
 0x242   : > { %2242 = vmatpush1.bf16.msra.mxu0 %v3277_v50 }
 0x243   : > { %2414 = vmatpush1.bf16.msra.mxu1 %v3280_v51  ;;  %2243 = vmatprep.subr.bf16.mxu0 %v3285_v52  ;;  %v2471_v51 = vunpack.c.0.s8 (!%p2851_p4), %v2470_v47 }
 0x244   : > { %2415 = vmatprep.subr.bf16.mxu1 %v3288_v53 }
 0x245   : > { %v2474_v52 = vsub.s32 (!%p2851_p4), %v2471_v51, %v793_v8 }
 0x246   : > { %2244 = vmatpush1.bf16.msra.mxu0 %v3283_v54 }
 0x247   : > { %2416 = vmatpush1.bf16.msra.mxu1 %v3286_v55  ;;  %2245 = vmatprep.subr.bf16.mxu0 %v3291_v56 }
 0x248   : > { %2417 = vmatprep.subr.bf16.mxu1 %v3294_v57 }
 0x24a   : > { %2246 = vmatpush1.bf16.msra.mxu0 %v3289_v58 }
 0x24b   : > { %2418 = vmatpush1.bf16.msra.mxu1 %v3292_v59  ;;  %2247 = vmatprep.subr.bf16.mxu0 %v3297_v60 }
 0x24c   : > { %2419 = vmatprep.subr.bf16.mxu1 %v3300_v61 }
 0x24e   : > { %2248 = vmatpush1.bf16.msra.mxu0 %v3295_v62 }
 0x24f   : > { %2420 = vmatpush1.bf16.msra.mxu1 %v3298_v63  ;;  %2249 = vmatprep.subr.bf16.mxu0 %v3303_v0 }
 0x250   : > { %2421 = vmatprep.subr.bf16.mxu1 %v3306_v1 }
 0x252   : > { %2250 = vmatpush1.bf16.msra.mxu0 %v3301_v2 }
 0x253   : > { %2422 = vmatpush1.bf16.msra.mxu1 %v3304_v3  ;;  %2251 = vmatprep.subr.bf16.mxu0 %v3309_v4 }
 0x254   : > { %2423 = vmatprep.subr.bf16.mxu1 %v3312_v5 }
 0x256   : > { %2252 = vmatpush1.bf16.msra.mxu0 %v3307_v6 }
 0x257   : > { %2424 = vmatpush1.bf16.msra.mxu1 %v3310_v7 }
 0x259   : > { %2254 = vmatmul.mubr.bf16.vlgmr.msra.gmra.mrb[8].mxu0 %v3527_v13 }
 0x25a   : > { %2426 = vmatmul.mubr.bf16.vlgmr.msra.gmra.mrb[8].mxu1 %v3527_v13 }
 0x32c   : > { %v2255_v21 = vpop.f32.mrb[8].mxu0 }
 0x32d   : > { %v2857_v12 = vadd.f32 %v2255_v21, %v795_v16  ;;  %v2427_v22 = vpop.f32.mrb[8].mxu1  ;;  %v2257_v23 = vpop.f32.mrb[9].mxu0 }
 0x32e   : > { %v2861_v13 = vadd.f32 %v2427_v22, %v803_v49  ;;  %v2858_v18 = vadd.f32 %v2257_v23, %v799_v17  ;;  %v2429_v19 = vpop.f32.mrb[9].mxu1  ;;  %v2259_v24 = vpop.f32.mrb[10].mxu0 }
 0x32f   : > { %3313 = vtanh.f32 %v2857_v12  ;;  %v2862_v25 = vadd.f32 %v2429_v19, %v807_v20  ;;  %v2859_v27 = vadd.f32 %v2259_v24, %v795_v16  ;;  %v2431_v28 = vpop.f32.mrb[10].mxu1  ;;  %v2261_v29 = vpop.f32.mrb[11].mxu0 }
 0x330   : > { %3315 = vtanh.f32 %v2861_v13  ;;  %v2863_v30 = vadd.f32 %v2431_v28, %v803_v49  ;;  %v2433_v31 = vpop.f32.mrb[11].mxu1  ;;  %v2860_v32 = vadd.f32 %v2261_v29, %v799_v17 }
 0x331   : > { %3317 = vtanh.f32 %v2858_v18  ;;  %v2864_v33 = vadd.f32 %v2433_v31, %v807_v20 }
 0x332   : > { %3319 = vtanh.f32 %v2862_v25 }
 0x333   : > { %3321 = vtanh.f32 %v2859_v27 }
 0x334   : > { %3323 = vtanh.f32 %v2863_v30 }
 0x335   : > { %3325 = vtanh.f32 %v2860_v32 }
 0x336   : > { %3327 = vtanh.f32 %v2864_v33 }
 0x339   : > { %v3314_v34 = vpop.eup %3313 }
 0x33a   : > { %v3316_v35 = vpop.eup %3315 }
 0x33b   : > { %v3318_v36 = vpop.eup %3317 }
 0x33c   : > { %v3320_v37 = vpop.eup %3319  ;;  %v2467_v48 = vcombine.low (!%p2851_p4), %v3314_v34, %v3318_v36 }
 0x33d   : > { %v3322_v38 = vpop.eup %3321  ;;  %2462 = sbr.rel (%p2851_p4) target bundleno = 838 (0x346), region = 52  ;;  %v2468_v50 = vcombine.low (!%p2851_p4), %v3316_v35, %v3320_v37 }
 0x33e   : > { %v3324_v39 = vpop.eup %3323  ;;  %v2446_v40 = vpack.c.bf16 %v3322_v38, %v3314_v34  ;;  %v2475_v53 = vrot.slane (!%p2851_p4), %v2467_v48, %v2474_v52 }
 0x33f   : > { %v3326_v41 = vpop.eup %3325  ;;  %v2448_v42 = vpack.c.bf16 %v3324_v39, %v3316_v35  ;;  %v2482_v54 = vrot.slane (!%p2851_p4), %v2468_v50, %v2474_v52 }
 0x340   : > { %v3328_v43 = vpop.eup %3327  ;;  %2455 = vst [vmem:[%s2454_s10] sm:$0xff] %v2446_v40  ;;  %v2447_v44 = vpack.c.bf16 %v3326_v41, %v3318_v36 }
 0x341   : > { %2457 = vst [vmem:[%s2454_s10 + $0x10] sm:$0xff] %v2448_v42  ;;  %v2449_v45 = vpack.c.bf16 %v3328_v43, %v3320_v37  ;;  %v2483_v55 = vcombine.low (!%p2851_p4), %v2475_v53, %v2482_v54 }
 0x342   : > { %2456 = vst [vmem:[%s2454_s10 + $0x8] sm:$0xff] %v2447_v44 }
 0x343   : > { %2458 = vst [vmem:[%s2454_s10 + $0x18] sm:$0xff] %v2449_v45  ;;  %v2490_v56 = vrot.slane (!%p2851_p4), %v2483_v55, %v2474_v52 }
 0x345   : > { %2496 = vst.msk [vmem:[#allocation6] sm:$0xf] %vm2494_vm5, %v2490_v56 }
 0x346 PF: > { %p2903_p6 = scmp.eq.s32.totalorder %s3443_s19, 2  ;;  %s3406_s11 = smov [#allocation6]  }
 0x347   : > { %s2504_s12 = sshll.u32 %s3406_s11, 4  ;;  %s2505_s12 = int_to_ptr.vmem [resolvable:$true] %s2504_s12 }
 0x348   : > { %s3357_s13 = scalar_lea.vmem %s2505_s12, 64  ;;  %p3364_p13 = scmp.lt.s32.totalorder %s2505_s12, %s2505_s12 }
 0x349   : > { %p3358_p10 = scmp.ne.s32.totalorder %s2505_s12, %s3357_s13  ;;  %p3365_p0 = scmp.lt.s32.totalorder %s3357_s13, %s3357_s13 }
 0x34b   : > { %p3359_p11 = pnand %p3358_p10, %p2903_p6  ;;  %p3366_p1 = por %p3365_p0, %p3364_p13 }
 0x34d   : > { %p3360_p12 = pneg %p3359_p11 }
 0x34f   : > { %p3367_p5 = pnand %p3366_p1, %p3360_p12 }
 0x351   : > { %3370 = shalt.err (!%p3367_p5)
}
 0x352   : > { %s3371_s16 = scalar_lea.hbm %s3581_s5, 64 }
 0x353   : > { %p3372_p7 = scmp.ne.s32.totalorder %s3581_s5, %s3371_s16  ;;  %p3377_p2 = scmp.lt.u32.totalorder %s3371_s16, %s3581_s5 }
 0x355   : > { %p3373_p9 = pnand %p3372_p7, %p2903_p6 }
 0x357   : > { %p3374_p8 = pneg %p3373_p9 }
 0x359   : > { %p3379_p3 = pnand %p3377_p2, %p3374_p8 }
 0x35b   : > { %3382 = shalt.err (!%p3379_p3)
}
 0x35c   : > { %2894 = dma.vmem_to_hbm [thread:$0]  (%p2903_p6), %s2505_s12, 64, %s3581_s5, [#allocation5]  }
 0x35d   : > { %3392 = dma.done.wait (%p2903_p6), [#allocation5], 64  }
 0x35e   : > { %3394 = vsyncadd (%p2903_p6), [#allocation5], 4294967232 }
 0x35f PF: > { %s17_s18 = sadd.s32 1, %s3397_s18  }
 0x360   : > { %p14_p4 = scmp.ge.s32.totalorder %s17_s18, 5  }
 0x362   :  { %16 = sbr.rel (!%p14_p4) target bundleno = 2 (0x2), region = 84 }
 0x369   :  { %2517 = vsyncpa [#allocation4], 1 }
 0x36a   :  { %2519 = vsyncpa [#allocation4 + $0x1], 1 }
 0x36b   :  { %2520 = vsyncpa [#allocation5], 1 }
 0x36c   :  { %2522 = vsyncpa [#allocation5 + $0x1], 1 }

</bundles_post_ra>
